<compile_context>
chip_gen: v5e
topology: v5e:2x2
jax: 0.10.0
libtpu: 0.0.40
codegen_flags: <defaults>
</compile_context>

<pallas_src>
import functools

import jax
import jax.numpy as jnp
from jax import lax
from jax.experimental import pallas as pl
from jax.experimental.pallas import tpu as pltpu


# --------------------------------------------------------------------------------------
# helpers
# --------------------------------------------------------------------------------------

def _layer_norm(x, w, b, eps=1e-5):
    """LayerNorm over the last dim, f32 math. x: (rows, C); w, b: (1, C)."""
    mu = jnp.mean(x, axis=-1, keepdims=True)
    var = jnp.mean((x - mu) ** 2, axis=-1, keepdims=True)
    return (x - mu) * lax.rsqrt(var + eps) * w.astype(jnp.float32) + b.astype(jnp.float32)


def _pick_batch_block(batch, seq, target_rows=512, min_grid=2):
    """Largest divisor of `batch` with bb*seq ~ target_rows, keeping >= min_grid steps
    so v7x megacore can split the batch axis."""
    bb = max(1, min(batch, -(-target_rows // seq)))
    while batch % bb:
        bb -= 1
    while batch // bb < min_grid and bb > 1:
        bb -= 1
        while batch % bb:
            bb -= 1
    return bb


def _pick_vocab_tile(vocab, max_tile=8192):
    """Largest multiple-of-128 divisor of vocab (capped) -> lane-dense unmasked stores."""
    if vocab % 128:
        return vocab  # TODO(synk): pad vocab to a multiple of 128 at production sizes
    vt = min(vocab, max_tile)
    vt -= vt % 128
    while vocab % vt:
        vt -= 128
    return vt


@functools.lru_cache(maxsize=None)
def _single_buffer_mode():
    """pl.Buffered(1) => keep constant weights single-buffered (halves weight VMEM,
    required to fit production C under v7x's 64 MiB). Probed once; None if unsupported."""
    def _copy(x_ref, o_ref):
        o_ref[...] = x_ref[...]

    try:
        mode = pl.Buffered(1)
        x = jnp.arange(8 * 128, dtype=jnp.float32).reshape(8, 128)
        out = pl.pallas_call(
            _copy,
            out_shape=jax.ShapeDtypeStruct((8, 128), jnp.float32),
            grid=(1,),
            in_specs=[pl.BlockSpec((8, 128), lambda i: (0, 0), pipeline_mode=mode)],
            out_specs=pl.BlockSpec((8, 128), lambda i: (0, 0)),
        )(x)
        out = jax.block_until_ready(out)
        if bool(jnp.allclose(out, x)):
            return mode
        return None
    except Exception:  # pragma: no cover - older jax without per-spec buffering
        return None


def _weight_spec_factory():
    """BlockSpec builder for grid-invariant (constant) weights."""
    mode = _single_buffer_mode()

    def wspec(shape):
        if mode is None:
            return pl.BlockSpec(shape, lambda *_: (0, 0))
        return pl.BlockSpec(shape, lambda *_: (0, 0), pipeline_mode=mode)

    return wspec, mode


# --------------------------------------------------------------------------------------
# Pallas kernel: one transformer block (LN -> causal MHA -> +res, LN -> FFN -> +res)
# --------------------------------------------------------------------------------------

def transformer_block_kernel(
    x_ref,                       # (Bb, T, C) activations (f32 or bf16)
    ln1_w_ref, ln1_b_ref,        # (1, C), (1, C)
    wqkv_ref,                    # (C, 3C)   fused Q/K/V projection (compute dtype)
    wo_ref, bo_ref,              # (C, C), (1, C)
    ln2_w_ref, ln2_b_ref,        # (1, C), (1, C)
    w1_ref, b1_ref,              # (C, 4C), (1, 4C)
    w2_ref, b2_ref,              # (4C, C), (1, C)
    o_ref,                       # (Bb, T, C)
    attn_sc,                     # VMEM scratch (Bb*T, C) f32: packed head outputs
    *, n_heads: int, compute_dtype,
):
    Bb, T, C = x_ref.shape
    hs = C // n_heads
    rows = Bb * T
    f32 = jnp.float32

    def mm(a, b):  # MXU matmul: compute-dtype operands, f32 accumulation
        return jnp.dot(a.astype(compute_dtype), b.astype(compute_dtype),
                       preferred_element_type=f32)

    x = x_ref[...].astype(f32).reshape(rows, C)                   # flatten batch rows

    # ---- LayerNorm 1 + fused QKV projection (single M = Bb*T GEMM) ----
    xn = _layer_norm(x, ln1_w_ref[...], ln1_b_ref[...])
    qkv = mm(xn, wqkv_ref[...])                                   # (rows, 3C) f32
    q = qkv[:, 0 * C:1 * C].reshape(Bb, T, C)
    k = qkv[:, 1 * C:2 * C].reshape(Bb, T, C)
    v = qkv[:, 2 * C:3 * C].reshape(Bb, T, C)

    # causal additive mask, computed once per grid step (f32 only: -1e30 overflows bf16)
    row_i = lax.broadcasted_iota(jnp.int32, (T, T), 0)
    col_i = lax.broadcasted_iota(jnp.int32, (T, T), 1)
    neg_mask = jnp.where(row_i >= col_i, 0.0, -1e30).astype(f32)  # (T, T)
    scale = hs ** -0.5

    # Per-head attention: 3-D einsums batched over Bb; each head's output is written
    # into its column slice of the (rows, C) scratch so the output projection is a
    # single (rows, C) x (C, C) GEMM against the full Wo.
    for h in range(n_heads):                                      # static unroll (small)
        sl = slice(h * hs, (h + 1) * hs)
        qh = q[:, :, sl].astype(compute_dtype)                    # (Bb, T, hs)
        kh = k[:, :, sl].astype(compute_dtype)
        vh = v[:, :, sl].astype(compute_dtype)
        s = jnp.einsum("bqd,bkd->bqk", qh, kh,
                       preferred_element_type=f32) * scale        # (Bb, T, T) f32
        s = s + neg_mask[None, :, :]
        s = s - jnp.max(s, axis=-1, keepdims=True)
        p = jnp.exp(s)
        p = p * pl.reciprocal(jnp.sum(p, axis=-1, keepdims=True), approx=True)
        oh = jnp.einsum("bqk,bkd->bqd", p.astype(compute_dtype), vh,
                        preferred_element_type=f32)               # (Bb, T, hs) f32
        attn_sc[:, sl] = oh.reshape(rows, hs)

    attn = mm(attn_sc[...], wo_ref[...]) + bo_ref[...].astype(f32)   # one K=C GEMM
    x1 = x + attn                                                 # dropout == identity

    # ---- LayerNorm 2 + FeedForward (Linear -> ReLU -> Linear) + residual ----
    x2n = _layer_norm(x1, ln2_w_ref[...], ln2_b_ref[...])
    h1 = jnp.maximum(mm(x2n, w1_ref[...]) + b1_ref[...].astype(f32), 0.0)
    ffn = mm(h1, w2_ref[...]) + b2_ref[...].astype(f32)           # dropout == identity

    o_ref[...] = (x1 + ffn).reshape(Bb, T, C).astype(o_ref.dtype)


def transformer_block_pallas(x, p, n_heads, compute_dtype):
    B, T, C = x.shape
    Hf = p["w1"].shape[1]
    Bb = _pick_batch_block(B, T)
    wspec, mode = _weight_spec_factory()

    weight_keys = ("ln1_w", "ln1_b", "wqkv", "wo", "bo", "ln2_w", "ln2_b",
                   "w1", "b1", "w2", "b2")
    weight_bytes = sum(int(p[k].size) * p[k].dtype.itemsize for k in weight_keys)
    weight_bytes *= 1 if mode is not None else 2                  # single vs double buffer
    act_tile = Bb * T * C * x.dtype.itemsize
    inter = Bb * T * (3 * C + Hf + 4 * C) * 4 + Bb * n_heads * T * T * 4
    vmem_limit = int(min(128 << 20, weight_bytes + 4 * act_tile + inter + (16 << 20)))

    kernel = functools.partial(transformer_block_kernel,
                               n_heads=n_heads, compute_dtype=compute_dtype)
    return pl.pallas_call(
        kernel,
        out_shape=jax.ShapeDtypeStruct((B, T, C), x.dtype),
        grid_spec=pltpu.PrefetchScalarGridSpec(
            num_scalar_prefetch=0,
            grid=(B // Bb,),
            in_specs=[
                pl.BlockSpec((Bb, T, C), lambda b: (b, 0, 0)),    # activations (streamed)
                wspec((1, C)), wspec((1, C)),                     # ln1
                wspec((C, 3 * C)),                                # fused qkv
                wspec((C, C)), wspec((1, C)),                     # wo, bo
                wspec((1, C)), wspec((1, C)),                     # ln2
                wspec((C, Hf)), wspec((1, Hf)),                   # ffn w1, b1
                wspec((Hf, C)), wspec((1, C)),                    # ffn w2, b2
            ],
            out_specs=pl.BlockSpec((Bb, T, C), lambda b: (b, 0, 0)),
            scratch_shapes=[pltpu.VMEM((Bb * T, C), jnp.float32)],
        ),
        compiler_params=pltpu.CompilerParams(
            dimension_semantics=("parallel",),
            vmem_limit_bytes=vmem_limit),
    )(x, p["ln1_w"], p["ln1_b"], p["wqkv"], p["wo"], p["bo"],
      p["ln2_w"], p["ln2_b"], p["w1"], p["b1"], p["w2"], p["b2"])


# --------------------------------------------------------------------------------------
# Pallas kernel: final LayerNorm + lm head, tiled over the vocab axis
# --------------------------------------------------------------------------------------

def lm_head_kernel(x_ref, lnf_w_ref, lnf_b_ref, wh_ref, bh_ref, o_ref, *, compute_dtype):
    Bb, T, C = x_ref.shape
    Vt = o_ref.shape[-1]
    x = x_ref[...].astype(jnp.float32).reshape(Bb * T, C)
    xn = _layer_norm(x, lnf_w_ref[...], lnf_b_ref[...])           # recomputed per V-tile (cheap)
    logits = jnp.dot(xn.astype(compute_dtype), wh_ref[...].astype(compute_dtype),
                     preferred_element_type=jnp.float32) + bh_ref[...].astype(jnp.float32)
    o_ref[...] = logits.reshape(Bb, T, Vt).astype(o_ref.dtype)


def lm_head_pallas(x, lnf_w, lnf_b, w_head, b_head, compute_dtype):
    B, T, C = x.shape
    V = w_head.shape[1]
    Bb = _pick_batch_block(B, T)
    Vt = _pick_vocab_tile(V)
    wspec, _ = _weight_spec_factory()

    wbytes = w_head.dtype.itemsize
    vmem_limit = int(min(128 << 20,
                         2 * (C * Vt + Vt) * wbytes                 # streamed weight/bias tiles
                         + 2 * (Bb * T * C * x.dtype.itemsize + Bb * T * Vt * 4)
                         + (16 << 20)))

    kernel = functools.partial(lm_head_kernel, compute_dtype=compute_dtype)
    return pl.pallas_call(
        kernel,
        out_shape=jax.ShapeDtypeStruct((B, T, V), jnp.float32),
        grid_spec=pltpu.PrefetchScalarGridSpec(
            num_scalar_prefetch=0,
            grid=(B // Bb, V // Vt),
            in_specs=[
                pl.BlockSpec((Bb, T, C), lambda b, j: (b, 0, 0)),
                wspec((1, C)), wspec((1, C)),                     # lnf (constant)
                pl.BlockSpec((C, Vt), lambda b, j: (0, j)),       # head weight, vocab-tiled
                pl.BlockSpec((1, Vt), lambda b, j: (0, j)),       # head bias,   vocab-tiled
            ],
            out_specs=pl.BlockSpec((Bb, T, Vt), lambda b, j: (b, 0, j)),
        ),
        compiler_params=pltpu.CompilerParams(
            dimension_semantics=("parallel", "parallel"),
            vmem_limit_bytes=vmem_limit),
    )(x, lnf_w, lnf_b, w_head, b_head)


# --------------------------------------------------------------------------------------
# Full Transformer forward (eval mode, targets=None -> logits only)
# --------------------------------------------------------------------------------------

@functools.partial(jax.jit, static_argnames=("n_heads", "compute_dtype", "act_dtype"))
def transformer_forward(tokens, params, *, n_heads, compute_dtype, act_dtype=jnp.float32):
    T = tokens.shape[1]
    # Embedding gathers stay in XLA (no win from a Pallas gather at this size).
    x = jnp.take(params["tok_emb"], tokens, axis=0) + params["pos_emb"][:T][None]
    x = x.astype(act_dtype)          # inter-block activations carried in act_dtype
    # TODO(synk): cross-call prefetch of the next block's weights (P10) to hide weight DMA.
    for bp in params["blocks"]:
        x = transformer_block_pallas(x, bp, n_heads, compute_dtype)
    return lm_head_pallas(x, params["lnf_w"], params["lnf_b"],
                          params["w_head"], params["b_head"], compute_dtype)


# --------------------------------------------------------------------------------------
# Parameters
# --------------------------------------------------------------------------------------

def init_transformer_params(key, vocab_size, n_embed, block_size, n_blocks):
    C, H, V = n_embed, 4 * n_embed, vocab_size

    def linear(k, fan_in, shape):
        s = 1.0 / jnp.sqrt(fan_in)
        return jax.random.uniform(k, shape, jnp.float32, -s, s)

    def block_params(k):
        ks = jax.random.split(k, 8)
        wq = linear(ks[0], C, (C, C))
        wk = linear(ks[1], C, (C, C))
        wv = linear(ks[2], C, (C, C))
        return {
            "ln1_w": jnp.ones((1, C), jnp.float32), "ln1_b": jnp.zeros((1, C), jnp.float32),
            "wqkv": jnp.concatenate([wq, wk, wv], axis=1),
            "wo": linear(ks[3], C, (C, C)), "bo": linear(ks[4], C, (1, C)),
            "ln2_w": jnp.ones((1, C), jnp.float32), "ln2_b": jnp.zeros((1, C), jnp.float32),
            "w1": linear(ks[5], C, (C, H)), "b1": linear(ks[6], C, (1, H)),
            "w2": linear(ks[7], H, (H, C)), "b2": jnp.zeros((1, C), jnp.float32),
        }

    keys = jax.random.split(key, 2 + n_blocks)
    return {
        "tok_emb": 0.02 * jax.random.normal(keys[0], (V, C), jnp.float32),
        "pos_emb": 0.02 * jax.random.normal(keys[1], (block_size, C), jnp.float32),
        "blocks": [block_params(k) for k in keys[2:]],
        "lnf_w": jnp.ones((1, C), jnp.float32), "lnf_b": jnp.zeros((1, C), jnp.float32),
        "w_head": linear(jax.random.fold_in(key, 99), C, (C, V)),
        "b_head": jnp.zeros((1, V), jnp.float32),
    }


def cast_matmul_weights(params, dtype):
    """Store the big matmul weights in a narrow dtype so the kernels receive them
    directly (halves weight DMA + VMEM; no per-step VPU casts for weights)."""
    mats = {"wqkv", "wo", "w1", "w2"}
    new_blocks = [{k: (v.astype(dtype) if k in mats else v) for k, v in bp.items()}
                  for bp in params["blocks"]]
    out = dict(params)
    out["blocks"] = new_blocks
    out["w_head"] = params["w_head"].astype(dtype)
    return out


# --------------------------------------------------------------------------------------
# Pure-JAX reference (mirrors the kernel's compute/activation dtype pattern)
# --------------------------------------------------------------------------------------

def reference_forward(tokens, params, n_heads, compute_dtype, act_dtype=jnp.float32):
    cd = compute_dtype

    def mm(a, b):
        return jnp.dot(a.astype(cd), b.astype(cd), preferred_element_type=jnp.float32)

    def ln(v, w, b):
        mu = v.mean(-1, keepdims=True)
        var = ((v - mu) ** 2).mean(-1, keepdims=True)
        return (v - mu) * lax.rsqrt(var + 1e-5) * w + b

    T = tokens.shape[1]
    x = jnp.take(params["tok_emb"], tokens, axis=0) + params["pos_emb"][:T][None]
    x = x.astype(act_dtype).astype(jnp.float32)          # mirror the HBM act round-trip
    B, T, C = x.shape
    hs = C // n_heads
    mask = jnp.tril(jnp.ones((T, T), bool))

    for p in params["blocks"]:
        xn = ln(x, p["ln1_w"], p["ln1_b"])
        qkv = mm(xn.reshape(B * T, C), p["wqkv"])
        q = qkv[:, 0 * C:1 * C].reshape(B, T, n_heads, hs)
        k = qkv[:, 1 * C:2 * C].reshape(B, T, n_heads, hs)
        v = qkv[:, 2 * C:3 * C].reshape(B, T, n_heads, hs)
        att = jnp.einsum("bqhd,bkhd->bhqk", q.astype(cd), k.astype(cd),
                         preferred_element_type=jnp.float32) * hs ** -0.5
        att = jnp.where(mask[None, None], att, -jnp.inf)
        att = jax.nn.softmax(att, axis=-1)
        out = jnp.einsum("bhqk,bkhd->bqhd", att.astype(cd), v.astype(cd),
                         preferred_element_type=jnp.float32).reshape(B * T, C)
        x1 = x.reshape(B * T, C) + mm(out, p["wo"]) + p["bo"]
        x2n = ln(x1, p["ln2_w"], p["ln2_b"])
        h1 = jnp.maximum(mm(x2n, p["w1"]) + p["b1"], 0.0)
        x = (x1 + mm(h1, p["w2"]) + p["b2"]).reshape(B, T, C)
        x = x.astype(act_dtype).astype(jnp.float32)      # mirror the HBM act round-trip

    xf = ln(x.reshape(B * T, C), params["lnf_w"], params["lnf_b"])
    logits = mm(xf, params["w_head"]) + params["b_head"]
    return logits.reshape(B, T, -1)


# --------------------------------------------------------------------------------------

if __name__ == "__main__":
    # Toy config consistent with the module: vocab=128, n_embed=32, heads=4,
    # block_size=8, 4 transformer blocks, batch=2.
    vocab_size, n_embed, n_heads, block_size, n_blocks = 128, 32, 4, 8, 4
    B = 2

    key = jax.random.PRNGKey(0)
    kt, kp = jax.random.split(key)
    tokens = jax.random.randint(kt, (B, block_size), 0, vocab_size)
    params = init_transformer_params(kp, vocab_size, n_embed, block_size, n_blocks)

    # --- f32 MXU path (parity baseline) ---
    logits_f32 = transformer_forward(tokens, params, n_heads=n_heads,
                                     compute_dtype=jnp.float32, act_dtype=jnp.float32)
    logits_f32 = jax.block_until_ready(logits_f32)
    ref_f32 = reference_forward(tokens, params, n_heads, jnp.float32, jnp.float32)
    assert logits_f32.shape == (B, block_size, vocab_size)
    # tolerance loosened slightly for pl.reciprocal(approx=True) in the softmax
    assert jnp.allclose(logits_f32, ref_f32, atol=1e-2, rtol=1e-2), "f32 mismatch vs reference"

    # --- bf16 MXU path (v5e/v6e/v7x): bf16 weights + bf16 inter-block activations,
    #     f32 accumulation; LayerNorm/softmax stay f32.
    params_bf16 = cast_matmul_weights(params, jnp.bfloat16)
    logits_bf16 = transformer_forward(tokens, params_bf16, n_heads=n_heads,
                                      compute_dtype=jnp.bfloat16, act_dtype=jnp.bfloat16)
    logits_bf16 = jax.block_until_ready(logits_bf16)
    ref_bf16 = reference_forward(tokens, params_bf16, n_heads, jnp.bfloat16, jnp.bfloat16)
    assert jnp.allclose(logits_bf16, ref_bf16, atol=5e-2, rtol=5e-2), "bf16 mismatch vs reference"

    print("KERNEL_OK")
</pallas_src>

<mosaic_0001>
module attributes {stable_mosaic.version = 11 : i64} {
  func.func @lm_head_kernel(%arg0: i32, %arg1: i32, %arg2: memref<1x8x32xf32, #tpu.memory_space<vmem>>, %arg3: memref<1x32xf32, #tpu.memory_space<vmem>>, %arg4: memref<1x32xf32, #tpu.memory_space<vmem>>, %arg5: memref<32x128xf32, #tpu.memory_space<vmem>>, %arg6: memref<1x128xf32, #tpu.memory_space<vmem>>, %arg7: memref<1x8x128xf32, #tpu.memory_space<vmem>>) attributes {dimension_semantics = [#tpu.dimension_semantics<parallel>, #tpu.dimension_semantics<parallel>], iteration_bounds = array<i64: 2, 1>, scalar_prefetch = 0 : i64, scratch_operands = 0 : i64, tpu.core_type = #tpu.core_type<tc>, window_params = [{transform_indices = @transform_0, window_bounds = array<i64: 1, 8, 32>}, {pipeline_mode = #tpu.pipeline_mode<synchronous>, transform_indices = @transform_1, window_bounds = array<i64: 1, 32>}, {pipeline_mode = #tpu.pipeline_mode<synchronous>, transform_indices = @transform_2, window_bounds = array<i64: 1, 32>}, {transform_indices = @transform_3, window_bounds = array<i64: 32, 128>}, {transform_indices = @transform_4, window_bounds = array<i64: 1, 128>}, {transform_indices = @transform_5, window_bounds = array<i64: 1, 8, 128>}]} {
    %c0 = arith.constant 0 : index
    %c0_0 = arith.constant 0 : index
    %c0_1 = arith.constant 0 : index
    %0 = vector.load %arg2[%c0, %c0_0, %c0_1] : memref<1x8x32xf32, #tpu.memory_space<vmem>>, vector<1x8x32xf32>
    %1 = vector.shape_cast %0 : vector<1x8x32xf32> to vector<8x32xf32>
    %c0_2 = arith.constant 0 : index
    %c0_3 = arith.constant 0 : index
    %2 = vector.load %arg3[%c0_2, %c0_3] : memref<1x32xf32, #tpu.memory_space<vmem>>, vector<1x32xf32>
    %c0_4 = arith.constant 0 : index
    %c0_5 = arith.constant 0 : index
    %3 = vector.load %arg4[%c0_4, %c0_5] : memref<1x32xf32, #tpu.memory_space<vmem>>, vector<1x32xf32>
    %cst = arith.constant dense<0.000000e+00> : vector<8xf32>
    %4 = vector.multi_reduction <add>, %1, %cst [1] : vector<8x32xf32> to vector<8xf32>
    %5 = vector.shape_cast %4 : vector<8xf32> to vector<8x1xf32>
    %cst_6 = arith.constant 3.200000e+01 : f32
    %6 = vector.broadcast %cst_6 : f32 to vector<8x1xf32>
    %7 = arith.divf %5, %6 : vector<8x1xf32>
    %8 = vector.broadcast %7 : vector<8x1xf32> to vector<8x32xf32>
    %9 = arith.subf %1, %8 : vector<8x32xf32>
    %10 = arith.mulf %9, %9 : vector<8x32xf32>
    %cst_7 = arith.constant dense<0.000000e+00> : vector<8xf32>
    %11 = vector.multi_reduction <add>, %10, %cst_7 [1] : vector<8x32xf32> to vector<8xf32>
    %12 = vector.shape_cast %11 : vector<8xf32> to vector<8x1xf32>
    %cst_8 = arith.constant 3.200000e+01 : f32
    %13 = vector.broadcast %cst_8 : f32 to vector<8x1xf32>
    %14 = arith.divf %12, %13 : vector<8x1xf32>
    %15 = vector.broadcast %7 : vector<8x1xf32> to vector<8x32xf32>
    %16 = arith.subf %1, %15 : vector<8x32xf32>
    %cst_9 = arith.constant 9.99999974E-6 : f32
    %17 = vector.broadcast %cst_9 : f32 to vector<8x1xf32>
    %18 = arith.addf %14, %17 : vector<8x1xf32>
    %19 = math.rsqrt %18 : vector<8x1xf32>
    %20 = vector.broadcast %19 : vector<8x1xf32> to vector<8x32xf32>
    %21 = arith.mulf %16, %20 : vector<8x32xf32>
    %22 = vector.broadcast %2 : vector<1x32xf32> to vector<8x32xf32>
    %23 = arith.mulf %21, %22 : vector<8x32xf32>
    %24 = vector.broadcast %3 : vector<1x32xf32> to vector<8x32xf32>
    %25 = arith.addf %23, %24 : vector<8x32xf32>
    %c0_10 = arith.constant 0 : index
    %c0_11 = arith.constant 0 : index
    %26 = vector.load %arg5[%c0_10, %c0_11] : memref<32x128xf32, #tpu.memory_space<vmem>>, vector<32x128xf32>
    %cst_12 = arith.constant dense<0.000000e+00> : vector<8x128xf32>
    %27 = tpu.matmul %25, %26, %cst_12 {dimension_numbers = #tpu.dot_dimension_numbers<[1], [0], [0], [1], [0, 0, 1, 1], [], []>} : vector<8x32xf32>, vector<32x128xf32>, vector<8x128xf32> -> vector<8x128xf32>
    %c0_13 = arith.constant 0 : index
    %c0_14 = arith.constant 0 : index
    %28 = vector.load %arg6[%c0_13, %c0_14] : memref<1x128xf32, #tpu.memory_space<vmem>>, vector<1x128xf32>
    %29 = vector.broadcast %28 : vector<1x128xf32> to vector<8x128xf32>
    %30 = arith.addf %27, %29 : vector<8x128xf32>
    %31 = vector.shape_cast %30 : vector<8x128xf32> to vector<1x8x128xf32>
    %c0_15 = arith.constant 0 : index
    %c0_16 = arith.constant 0 : index
    %c0_17 = arith.constant 0 : index
    %32 = vector.load %arg7[%c0_15, %c0_16, %c0_17] : memref<1x8x128xf32, #tpu.memory_space<vmem>>, vector<1x8x128xf32>
    tpu.vector_store %arg7[%c0_15, %c0_16, %c0_17], %31 {strides = array<i32>} : memref<1x8x128xf32, #tpu.memory_space<vmem>>, vector<1x8x128xf32>,
    return
  }
  func.func @transform_0(%arg0: i32, %arg1: i32) -> (i32, i32, i32) {
    %c0_i32 = arith.constant 0 : i32
    %c0_i32_0 = arith.constant 0 : i32
    %c0_i32_1 = arith.constant 0 : i32
    return %arg0, %c0_i32, %c0_i32_0 : i32, i32, i32
  }
  func.func @transform_1(%arg0: i32, %arg1: i32) -> (i32, i32) {
    %c0_i32 = arith.constant 0 : i32
    %c0_i32_0 = arith.constant 0 : i32
    %c0_i32_1 = arith.constant 0 : i32
    return %c0_i32, %c0_i32_0 : i32, i32
  }
  func.func @transform_2(%arg0: i32, %arg1: i32) -> (i32, i32) {
    %c0_i32 = arith.constant 0 : i32
    %c0_i32_0 = arith.constant 0 : i32
    %c0_i32_1 = arith.constant 0 : i32
    return %c0_i32, %c0_i32_0 : i32, i32
  }
  func.func @transform_3(%arg0: i32, %arg1: i32) -> (i32, i32) {
    %c0_i32 = arith.constant 0 : i32
    %c0_i32_0 = arith.constant 0 : i32
    return %c0_i32, %arg1 : i32, i32
  }
  func.func @transform_4(%arg0: i32, %arg1: i32) -> (i32, i32) {
    %c0_i32 = arith.constant 0 : i32
    %c0_i32_0 = arith.constant 0 : i32
    return %c0_i32, %arg1 : i32, i32
  }
  func.func @transform_5(%arg0: i32, %arg1: i32) -> (i32, i32, i32) {
    %c0_i32 = arith.constant 0 : i32
    %c0_i32_0 = arith.constant 0 : i32
    return %arg0, %c0_i32, %arg1 : i32, i32, i32
  }
}

module attributes {stable_mosaic.version = 11 : i64} {
  func.func @transformer_block_kernel(%arg0: i32, %arg1: memref<1x8x32xf32, #tpu.memory_space<vmem>>, %arg2: memref<1x32xf32, #tpu.memory_space<vmem>>, %arg3: memref<1x32xf32, #tpu.memory_space<vmem>>, %arg4: memref<32x96xf32, #tpu.memory_space<vmem>>, %arg5: memref<32x32xf32, #tpu.memory_space<vmem>>, %arg6: memref<1x32xf32, #tpu.memory_space<vmem>>, %arg7: memref<1x32xf32, #tpu.memory_space<vmem>>, %arg8: memref<1x32xf32, #tpu.memory_space<vmem>>, %arg9: memref<32x128xf32, #tpu.memory_space<vmem>>, %arg10: memref<1x128xf32, #tpu.memory_space<vmem>>, %arg11: memref<128x32xf32, #tpu.memory_space<vmem>>, %arg12: memref<1x32xf32, #tpu.memory_space<vmem>>, %arg13: memref<1x8x32xf32, #tpu.memory_space<vmem>>, %arg14: memref<8x32xf32, #tpu.memory_space<vmem>>) attributes {dimension_semantics = [#tpu.dimension_semantics<parallel>], iteration_bounds = array<i64: 2>, scalar_prefetch = 0 : i64, scratch_operands = 1 : i64, tpu.core_type = #tpu.core_type<tc>, window_params = [{transform_indices = @transform_0, window_bounds = array<i64: 1, 8, 32>}, {pipeline_mode = #tpu.pipeline_mode<synchronous>, transform_indices = @transform_1, window_bounds = array<i64: 1, 32>}, {pipeline_mode = #tpu.pipeline_mode<synchronous>, transform_indices = @transform_2, window_bounds = array<i64: 1, 32>}, {pipeline_mode = #tpu.pipeline_mode<synchronous>, transform_indices = @transform_3, window_bounds = array<i64: 32, 96>}, {pipeline_mode = #tpu.pipeline_mode<synchronous>, transform_indices = @transform_4, window_bounds = array<i64: 32, 32>}, {pipeline_mode = #tpu.pipeline_mode<synchronous>, transform_indices = @transform_5, window_bounds = array<i64: 1, 32>}, {pipeline_mode = #tpu.pipeline_mode<synchronous>, transform_indices = @transform_6, window_bounds = array<i64: 1, 32>}, {pipeline_mode = #tpu.pipeline_mode<synchronous>, transform_indices = @transform_7, window_bounds = array<i64: 1, 32>}, {pipeline_mode = #tpu.pipeline_mode<synchronous>, transform_indices = @transform_8, window_bounds = array<i64: 32, 128>}, {pipeline_mode = #tpu.pipeline_mode<synchronous>, transform_indices = @transform_9, window_bounds = array<i64: 1, 128>}, {pipeline_mode = #tpu.pipeline_mode<synchronous>, transform_indices = @transform_10, window_bounds = array<i64: 128, 32>}, {pipeline_mode = #tpu.pipeline_mode<synchronous>, transform_indices = @transform_11, window_bounds = array<i64: 1, 32>}, {transform_indices = @transform_12, window_bounds = array<i64: 1, 8, 32>}]} {
    %c0 = arith.constant 0 : index
    %c0_0 = arith.constant 0 : index
    %c0_1 = arith.constant 0 : index
    %0 = vector.load %arg1[%c0, %c0_0, %c0_1] : memref<1x8x32xf32, #tpu.memory_space<vmem>>, vector<1x8x32xf32>
    %1 = vector.shape_cast %0 : vector<1x8x32xf32> to vector<8x32xf32>
    %c0_2 = arith.constant 0 : index
    %c0_3 = arith.constant 0 : index
    %2 = vector.load %arg2[%c0_2, %c0_3] : memref<1x32xf32, #tpu.memory_space<vmem>>, vector<1x32xf32>
    %c0_4 = arith.constant 0 : index
    %c0_5 = arith.constant 0 : index
    %3 = vector.load %arg3[%c0_4, %c0_5] : memref<1x32xf32, #tpu.memory_space<vmem>>, vector<1x32xf32>
    %cst = arith.constant dense<0.000000e+00> : vector<8xf32>
    %4 = vector.multi_reduction <add>, %1, %cst [1] : vector<8x32xf32> to vector<8xf32>
    %5 = vector.shape_cast %4 : vector<8xf32> to vector<8x1xf32>
    %cst_6 = arith.constant 3.200000e+01 : f32
    %6 = vector.broadcast %cst_6 : f32 to vector<8x1xf32>
    %7 = arith.divf %5, %6 : vector<8x1xf32>
    %8 = vector.broadcast %7 : vector<8x1xf32> to vector<8x32xf32>
    %9 = arith.subf %1, %8 : vector<8x32xf32>
    %10 = arith.mulf %9, %9 : vector<8x32xf32>
    %cst_7 = arith.constant dense<0.000000e+00> : vector<8xf32>
    %11 = vector.multi_reduction <add>, %10, %cst_7 [1] : vector<8x32xf32> to vector<8xf32>
    %12 = vector.shape_cast %11 : vector<8xf32> to vector<8x1xf32>
    %cst_8 = arith.constant 3.200000e+01 : f32
    %13 = vector.broadcast %cst_8 : f32 to vector<8x1xf32>
    %14 = arith.divf %12, %13 : vector<8x1xf32>
    %15 = vector.broadcast %7 : vector<8x1xf32> to vector<8x32xf32>
    %16 = arith.subf %1, %15 : vector<8x32xf32>
    %cst_9 = arith.constant 9.99999974E-6 : f32
    %17 = vector.broadcast %cst_9 : f32 to vector<8x1xf32>
    %18 = arith.addf %14, %17 : vector<8x1xf32>
    %19 = math.rsqrt %18 : vector<8x1xf32>
    %20 = vector.broadcast %19 : vector<8x1xf32> to vector<8x32xf32>
    %21 = arith.mulf %16, %20 : vector<8x32xf32>
    %22 = vector.broadcast %2 : vector<1x32xf32> to vector<8x32xf32>
    %23 = arith.mulf %21, %22 : vector<8x32xf32>
    %24 = vector.broadcast %3 : vector<1x32xf32> to vector<8x32xf32>
    %25 = arith.addf %23, %24 : vector<8x32xf32>
    %c0_10 = arith.constant 0 : index
    %c0_11 = arith.constant 0 : index
    %26 = vector.load %arg4[%c0_10, %c0_11] : memref<32x96xf32, #tpu.memory_space<vmem>>, vector<32x96xf32>
    %cst_12 = arith.constant dense<0.000000e+00> : vector<8x96xf32>
    %27 = tpu.matmul %25, %26, %cst_12 {dimension_numbers = #tpu.dot_dimension_numbers<[1], [0], [0], [1], [0, 0, 1, 1], [], []>} : vector<8x32xf32>, vector<32x96xf32>, vector<8x96xf32> -> vector<8x96xf32>
    %28 = vector.extract_strided_slice %27 {offsets = [0, 0], sizes = [8, 32], strides = [1, 1]} : vector<8x96xf32> to vector<8x32xf32>
    %29 = vector.shape_cast %28 : vector<8x32xf32> to vector<1x8x32xf32>
    %30 = vector.extract_strided_slice %27 {offsets = [0, 32], sizes = [8, 32], strides = [1, 1]} : vector<8x96xf32> to vector<8x32xf32>
    %31 = vector.shape_cast %30 : vector<8x32xf32> to vector<1x8x32xf32>
    %32 = vector.extract_strided_slice %27 {offsets = [0, 64], sizes = [8, 32], strides = [1, 1]} : vector<8x96xf32> to vector<8x32xf32>
    %33 = vector.shape_cast %32 : vector<8x32xf32> to vector<1x8x32xf32>
    %34 = tpu.iota {dimensions = array<i32: 0>} : vector<8x8xi32>
    %35 = tpu.iota {dimensions = array<i32: 1>} : vector<8x8xi32>
    %36 = arith.cmpi sge, %34, %35 : vector<8x8xi32>
    %cst_13 = arith.constant 0.000000e+00 : f32
    %cst_14 = arith.constant -1.000000e+30 : f32
    %37 = vector.broadcast %cst_13 : f32 to vector<8x8xf32>
    %38 = vector.broadcast %cst_14 : f32 to vector<8x8xf32>
    %39 = arith.select %36, %37, %38 : vector<8x8xi1>, vector<8x8xf32>
    %40 = vector.extract_strided_slice %29 {offsets = [0, 0, 0], sizes = [1, 8, 8], strides = [1, 1, 1]} : vector<1x8x32xf32> to vector<1x8x8xf32>
    %41 = vector.extract_strided_slice %31 {offsets = [0, 0, 0], sizes = [1, 8, 8], strides = [1, 1, 1]} : vector<1x8x32xf32> to vector<1x8x8xf32>
    %42 = vector.extract_strided_slice %33 {offsets = [0, 0, 0], sizes = [1, 8, 8], strides = [1, 1, 1]} : vector<1x8x32xf32> to vector<1x8x8xf32>
    "tpu.trace_start"() <{level = 10 : i32, message = "bqd,bkd->bqk"}> : () -> ()
    %cst_15 = arith.constant dense<0.000000e+00> : vector<1x8x8xf32>
    %43 = tpu.matmul %40, %41, %cst_15 {dimension_numbers = #tpu.dot_dimension_numbers<[2], [2], [1], [1], [0, 0, 0, 1, 1, 1], [0], [0]>} : vector<1x8x8xf32>, vector<1x8x8xf32>, vector<1x8x8xf32> -> vector<1x8x8xf32>
    "tpu.trace_stop"() : () -> ()
    %cst_16 = arith.constant 0.353553385 : f32
    %44 = vector.broadcast %cst_16 : f32 to vector<1x8x8xf32>
    %45 = arith.mulf %43, %44 : vector<1x8x8xf32>
    %46 = vector.shape_cast %39 : vector<8x8xf32> to vector<1x8x8xf32>
    %47 = arith.addf %45, %46 : vector<1x8x8xf32>
    %cst_17 = arith.constant dense<0xFF800000> : vector<1x8xf32>
    %48 = vector.multi_reduction <maximumf>, %47, %cst_17 [2] : vector<1x8x8xf32> to vector<1x8xf32>
    %49 = vector.shape_cast %48 : vector<1x8xf32> to vector<1x8x1xf32>
    %50 = vector.broadcast %49 : vector<1x8x1xf32> to vector<1x8x8xf32>
    %51 = arith.subf %47, %50 : vector<1x8x8xf32>
    %52 = math.exp %51 : vector<1x8x8xf32>
    %cst_18 = arith.constant dense<0.000000e+00> : vector<1x8xf32>
    %53 = vector.multi_reduction <add>, %52, %cst_18 [2] : vector<1x8x8xf32> to vector<1x8xf32>
    %54 = vector.shape_cast %53 : vector<1x8xf32> to vector<1x8x1xf32>
    %55 = tpu.reciprocal %54 {approx = true} : vector<1x8x1xf32> -> vector<1x8x1xf32>
    %56 = vector.broadcast %55 : vector<1x8x1xf32> to vector<1x8x8xf32>
    %57 = arith.mulf %52, %56 : vector<1x8x8xf32>
    "tpu.trace_start"() <{level = 10 : i32, message = "bqk,bkd->bqd"}> : () -> ()
    %cst_19 = arith.constant dense<0.000000e+00> : vector<1x8x8xf32>
    %58 = tpu.matmul %57, %42, %cst_19 {dimension_numbers = #tpu.dot_dimension_numbers<[2], [1], [1], [2], [0, 0, 0, 1, 1, 2], [0], [0]>} : vector<1x8x8xf32>, vector<1x8x8xf32>, vector<1x8x8xf32> -> vector<1x8x8xf32>
    "tpu.trace_stop"() : () -> ()
    %59 = vector.shape_cast %58 : vector<1x8x8xf32> to vector<8x8xf32>
    %c0_20 = arith.constant 0 : index
    %c0_21 = arith.constant 0 : index
    %60 = vector.load %arg14[%c0_20, %c0_21] : memref<8x32xf32, #tpu.memory_space<vmem>>, vector<8x8xf32>
    tpu.vector_store %arg14[%c0_20, %c0_21], %59 {strides = array<i32>} : memref<8x32xf32, #tpu.memory_space<vmem>>, vector<8x8xf32>,
    %61 = vector.extract_strided_slice %29 {offsets = [0, 0, 8], sizes = [1, 8, 8], strides = [1, 1, 1]} : vector<1x8x32xf32> to vector<1x8x8xf32>
    %62 = vector.extract_strided_slice %31 {offsets = [0, 0, 8], sizes = [1, 8, 8], strides = [1, 1, 1]} : vector<1x8x32xf32> to vector<1x8x8xf32>
    %63 = vector.extract_strided_slice %33 {offsets = [0, 0, 8], sizes = [1, 8, 8], strides = [1, 1, 1]} : vector<1x8x32xf32> to vector<1x8x8xf32>
    "tpu.trace_start"() <{level = 10 : i32, message = "bqd,bkd->bqk"}> : () -> ()
    %cst_22 = arith.constant dense<0.000000e+00> : vector<1x8x8xf32>
    %64 = tpu.matmul %61, %62, %cst_22 {dimension_numbers = #tpu.dot_dimension_numbers<[2], [2], [1], [1], [0, 0, 0, 1, 1, 1], [0], [0]>} : vector<1x8x8xf32>, vector<1x8x8xf32>, vector<1x8x8xf32> -> vector<1x8x8xf32>
    "tpu.trace_stop"() : () -> ()
    %cst_23 = arith.constant 0.353553385 : f32
    %65 = vector.broadcast %cst_23 : f32 to vector<1x8x8xf32>
    %66 = arith.mulf %64, %65 : vector<1x8x8xf32>
    %67 = vector.shape_cast %39 : vector<8x8xf32> to vector<1x8x8xf32>
    %68 = arith.addf %66, %67 : vector<1x8x8xf32>
    %cst_24 = arith.constant dense<0xFF800000> : vector<1x8xf32>
    %69 = vector.multi_reduction <maximumf>, %68, %cst_24 [2] : vector<1x8x8xf32> to vector<1x8xf32>
    %70 = vector.shape_cast %69 : vector<1x8xf32> to vector<1x8x1xf32>
    %71 = vector.broadcast %70 : vector<1x8x1xf32> to vector<1x8x8xf32>
    %72 = arith.subf %68, %71 : vector<1x8x8xf32>
    %73 = math.exp %72 : vector<1x8x8xf32>
    %cst_25 = arith.constant dense<0.000000e+00> : vector<1x8xf32>
    %74 = vector.multi_reduction <add>, %73, %cst_25 [2] : vector<1x8x8xf32> to vector<1x8xf32>
    %75 = vector.shape_cast %74 : vector<1x8xf32> to vector<1x8x1xf32>
    %76 = tpu.reciprocal %75 {approx = true} : vector<1x8x1xf32> -> vector<1x8x1xf32>
    %77 = vector.broadcast %76 : vector<1x8x1xf32> to vector<1x8x8xf32>
    %78 = arith.mulf %73, %77 : vector<1x8x8xf32>
    "tpu.trace_start"() <{level = 10 : i32, message = "bqk,bkd->bqd"}> : () -> ()
    %cst_26 = arith.constant dense<0.000000e+00> : vector<1x8x8xf32>
    %79 = tpu.matmul %78, %63, %cst_26 {dimension_numbers = #tpu.dot_dimension_numbers<[2], [1], [1], [2], [0, 0, 0, 1, 1, 2], [0], [0]>} : vector<1x8x8xf32>, vector<1x8x8xf32>, vector<1x8x8xf32> -> vector<1x8x8xf32>
    "tpu.trace_stop"() : () -> ()
    %80 = vector.shape_cast %79 : vector<1x8x8xf32> to vector<8x8xf32>
    %c0_27 = arith.constant 0 : index
    %c8 = arith.constant 8 : index
    %81 = vector.load %arg14[%c0_27, %c8] : memref<8x32xf32, #tpu.memory_space<vmem>>, vector<8x8xf32>
    tpu.vector_store %arg14[%c0_27, %c8], %80 {strides = array<i32>} : memref<8x32xf32, #tpu.memory_space<vmem>>, vector<8x8xf32>,
    %82 = vector.extract_strided_slice %29 {offsets = [0, 0, 16], sizes = [1, 8, 8], strides = [1, 1, 1]} : vector<1x8x32xf32> to vector<1x8x8xf32>
    %83 = vector.extract_strided_slice %31 {offsets = [0, 0, 16], sizes = [1, 8, 8], strides = [1, 1, 1]} : vector<1x8x32xf32> to vector<1x8x8xf32>
    %84 = vector.extract_strided_slice %33 {offsets = [0, 0, 16], sizes = [1, 8, 8], strides = [1, 1, 1]} : vector<1x8x32xf32> to vector<1x8x8xf32>
    "tpu.trace_start"() <{level = 10 : i32, message = "bqd,bkd->bqk"}> : () -> ()
    %cst_28 = arith.constant dense<0.000000e+00> : vector<1x8x8xf32>
    %85 = tpu.matmul %82, %83, %cst_28 {dimension_numbers = #tpu.dot_dimension_numbers<[2], [2], [1], [1], [0, 0, 0, 1, 1, 1], [0], [0]>} : vector<1x8x8xf32>, vector<1x8x8xf32>, vector<1x8x8xf32> -> vector<1x8x8xf32>
    "tpu.trace_stop"() : () -> ()
    %cst_29 = arith.constant 0.353553385 : f32
    %86 = vector.broadcast %cst_29 : f32 to vector<1x8x8xf32>
    %87 = arith.mulf %85, %86 : vector<1x8x8xf32>
    %88 = vector.shape_cast %39 : vector<8x8xf32> to vector<1x8x8xf32>
    %89 = arith.addf %87, %88 : vector<1x8x8xf32>
    %cst_30 = arith.constant dense<0xFF800000> : vector<1x8xf32>
    %90 = vector.multi_reduction <maximumf>, %89, %cst_30 [2] : vector<1x8x8xf32> to vector<1x8xf32>
    %91 = vector.shape_cast %90 : vector<1x8xf32> to vector<1x8x1xf32>
    %92 = vector.broadcast %91 : vector<1x8x1xf32> to vector<1x8x8xf32>
    %93 = arith.subf %89, %92 : vector<1x8x8xf32>
    %94 = math.exp %93 : vector<1x8x8xf32>
    %cst_31 = arith.constant dense<0.000000e+00> : vector<1x8xf32>
    %95 = vector.multi_reduction <add>, %94, %cst_31 [2] : vector<1x8x8xf32> to vector<1x8xf32>
    %96 = vector.shape_cast %95 : vector<1x8xf32> to vector<1x8x1xf32>
    %97 = tpu.reciprocal %96 {approx = true} : vector<1x8x1xf32> -> vector<1x8x1xf32>
    %98 = vector.broadcast %97 : vector<1x8x1xf32> to vector<1x8x8xf32>
    %99 = arith.mulf %94, %98 : vector<1x8x8xf32>
    "tpu.trace_start"() <{level = 10 : i32, message = "bqk,bkd->bqd"}> : () -> ()
    %cst_32 = arith.constant dense<0.000000e+00> : vector<1x8x8xf32>
    %100 = tpu.matmul %99, %84, %cst_32 {dimension_numbers = #tpu.dot_dimension_numbers<[2], [1], [1], [2], [0, 0, 0, 1, 1, 2], [0], [0]>} : vector<1x8x8xf32>, vector<1x8x8xf32>, vector<1x8x8xf32> -> vector<1x8x8xf32>
    "tpu.trace_stop"() : () -> ()
    %101 = vector.shape_cast %100 : vector<1x8x8xf32> to vector<8x8xf32>
    %c0_33 = arith.constant 0 : index
    %c16 = arith.constant 16 : index
    %102 = vector.load %arg14[%c0_33, %c16] : memref<8x32xf32, #tpu.memory_space<vmem>>, vector<8x8xf32>
    tpu.vector_store %arg14[%c0_33, %c16], %101 {strides = array<i32>} : memref<8x32xf32, #tpu.memory_space<vmem>>, vector<8x8xf32>,
    %103 = vector.extract_strided_slice %29 {offsets = [0, 0, 24], sizes = [1, 8, 8], strides = [1, 1, 1]} : vector<1x8x32xf32> to vector<1x8x8xf32>
    %104 = vector.extract_strided_slice %31 {offsets = [0, 0, 24], sizes = [1, 8, 8], strides = [1, 1, 1]} : vector<1x8x32xf32> to vector<1x8x8xf32>
    %105 = vector.extract_strided_slice %33 {offsets = [0, 0, 24], sizes = [1, 8, 8], strides = [1, 1, 1]} : vector<1x8x32xf32> to vector<1x8x8xf32>
    "tpu.trace_start"() <{level = 10 : i32, message = "bqd,bkd->bqk"}> : () -> ()
    %cst_34 = arith.constant dense<0.000000e+00> : vector<1x8x8xf32>
    %106 = tpu.matmul %103, %104, %cst_34 {dimension_numbers = #tpu.dot_dimension_numbers<[2], [2], [1], [1], [0, 0, 0, 1, 1, 1], [0], [0]>} : vector<1x8x8xf32>, vector<1x8x8xf32>, vector<1x8x8xf32> -> vector<1x8x8xf32>
    "tpu.trace_stop"() : () -> ()
    %cst_35 = arith.constant 0.353553385 : f32
    %107 = vector.broadcast %cst_35 : f32 to vector<1x8x8xf32>
    %108 = arith.mulf %106, %107 : vector<1x8x8xf32>
    %109 = vector.shape_cast %39 : vector<8x8xf32> to vector<1x8x8xf32>
    %110 = arith.addf %108, %109 : vector<1x8x8xf32>
    %cst_36 = arith.constant dense<0xFF800000> : vector<1x8xf32>
    %111 = vector.multi_reduction <maximumf>, %110, %cst_36 [2] : vector<1x8x8xf32> to vector<1x8xf32>
    %112 = vector.shape_cast %111 : vector<1x8xf32> to vector<1x8x1xf32>
    %113 = vector.broadcast %112 : vector<1x8x1xf32> to vector<1x8x8xf32>
    %114 = arith.subf %110, %113 : vector<1x8x8xf32>
    %115 = math.exp %114 : vector<1x8x8xf32>
    %cst_37 = arith.constant dense<0.000000e+00> : vector<1x8xf32>
    %116 = vector.multi_reduction <add>, %115, %cst_37 [2] : vector<1x8x8xf32> to vector<1x8xf32>
    %117 = vector.shape_cast %116 : vector<1x8xf32> to vector<1x8x1xf32>
    %118 = tpu.reciprocal %117 {approx = true} : vector<1x8x1xf32> -> vector<1x8x1xf32>
    %119 = vector.broadcast %118 : vector<1x8x1xf32> to vector<1x8x8xf32>
    %120 = arith.mulf %115, %119 : vector<1x8x8xf32>
    "tpu.trace_start"() <{level = 10 : i32, message = "bqk,bkd->bqd"}> : () -> ()
    %cst_38 = arith.constant dense<0.000000e+00> : vector<1x8x8xf32>
    %121 = tpu.matmul %120, %105, %cst_38 {dimension_numbers = #tpu.dot_dimension_numbers<[2], [1], [1], [2], [0, 0, 0, 1, 1, 2], [0], [0]>} : vector<1x8x8xf32>, vector<1x8x8xf32>, vector<1x8x8xf32> -> vector<1x8x8xf32>
    "tpu.trace_stop"() : () -> ()
    %122 = vector.shape_cast %121 : vector<1x8x8xf32> to vector<8x8xf32>
    %c0_39 = arith.constant 0 : index
    %c24 = arith.constant 24 : index
    %123 = vector.load %arg14[%c0_39, %c24] : memref<8x32xf32, #tpu.memory_space<vmem>>, vector<8x8xf32>
    tpu.vector_store %arg14[%c0_39, %c24], %122 {strides = array<i32>} : memref<8x32xf32, #tpu.memory_space<vmem>>, vector<8x8xf32>,
    %c0_40 = arith.constant 0 : index
    %c0_41 = arith.constant 0 : index
    %124 = vector.load %arg14[%c0_40, %c0_41] : memref<8x32xf32, #tpu.memory_space<vmem>>, vector<8x32xf32>
    %c0_42 = arith.constant 0 : index
    %c0_43 = arith.constant 0 : index
    %125 = vector.load %arg5[%c0_42, %c0_43] : memref<32x32xf32, #tpu.memory_space<vmem>>, vector<32x32xf32>
    %cst_44 = arith.constant dense<0.000000e+00> : vector<8x32xf32>
    %126 = tpu.matmul %124, %125, %cst_44 {dimension_numbers = #tpu.dot_dimension_numbers<[1], [0], [0], [1], [0, 0, 1, 1], [], []>} : vector<8x32xf32>, vector<32x32xf32>, vector<8x32xf32> -> vector<8x32xf32>
    %c0_45 = arith.constant 0 : index
    %c0_46 = arith.constant 0 : index
    %127 = vector.load %arg6[%c0_45, %c0_46] : memref<1x32xf32, #tpu.memory_space<vmem>>, vector<1x32xf32>
    %128 = vector.broadcast %127 : vector<1x32xf32> to vector<8x32xf32>
    %129 = arith.addf %126, %128 : vector<8x32xf32>
    %130 = arith.addf %1, %129 : vector<8x32xf32>
    %c0_47 = arith.constant 0 : index
    %c0_48 = arith.constant 0 : index
    %131 = vector.load %arg7[%c0_47, %c0_48] : memref<1x32xf32, #tpu.memory_space<vmem>>, vector<1x32xf32>
    %c0_49 = arith.constant 0 : index
    %c0_50 = arith.constant 0 : index
    %132 = vector.load %arg8[%c0_49, %c0_50] : memref<1x32xf32, #tpu.memory_space<vmem>>, vector<1x32xf32>
    %cst_51 = arith.constant dense<0.000000e+00> : vector<8xf32>
    %133 = vector.multi_reduction <add>, %130, %cst_51 [1] : vector<8x32xf32> to vector<8xf32>
    %134 = vector.shape_cast %133 : vector<8xf32> to vector<8x1xf32>
    %cst_52 = arith.constant 3.200000e+01 : f32
    %135 = vector.broadcast %cst_52 : f32 to vector<8x1xf32>
    %136 = arith.divf %134, %135 : vector<8x1xf32>
    %137 = vector.broadcast %136 : vector<8x1xf32> to vector<8x32xf32>
    %138 = arith.subf %130, %137 : vector<8x32xf32>
    %139 = arith.mulf %138, %138 : vector<8x32xf32>
    %cst_53 = arith.constant dense<0.000000e+00> : vector<8xf32>
    %140 = vector.multi_reduction <add>, %139, %cst_53 [1] : vector<8x32xf32> to vector<8xf32>
    %141 = vector.shape_cast %140 : vector<8xf32> to vector<8x1xf32>
    %cst_54 = arith.constant 3.200000e+01 : f32
    %142 = vector.broadcast %cst_54 : f32 to vector<8x1xf32>
    %143 = arith.divf %141, %142 : vector<8x1xf32>
    %144 = vector.broadcast %136 : vector<8x1xf32> to vector<8x32xf32>
    %145 = arith.subf %130, %144 : vector<8x32xf32>
    %cst_55 = arith.constant 9.99999974E-6 : f32
    %146 = vector.broadcast %cst_55 : f32 to vector<8x1xf32>
    %147 = arith.addf %143, %146 : vector<8x1xf32>
    %148 = math.rsqrt %147 : vector<8x1xf32>
    %149 = vector.broadcast %148 : vector<8x1xf32> to vector<8x32xf32>
    %150 = arith.mulf %145, %149 : vector<8x32xf32>
    %151 = vector.broadcast %131 : vector<1x32xf32> to vector<8x32xf32>
    %152 = arith.mulf %150, %151 : vector<8x32xf32>
    %153 = vector.broadcast %132 : vector<1x32xf32> to vector<8x32xf32>
    %154 = arith.addf %152, %153 : vector<8x32xf32>
    %c0_56 = arith.constant 0 : index
    %c0_57 = arith.constant 0 : index
    %155 = vector.load %arg9[%c0_56, %c0_57] : memref<32x128xf32, #tpu.memory_space<vmem>>, vector<32x128xf32>
    %cst_58 = arith.constant dense<0.000000e+00> : vector<8x128xf32>
    %156 = tpu.matmul %154, %155, %cst_58 {dimension_numbers = #tpu.dot_dimension_numbers<[1], [0], [0], [1], [0, 0, 1, 1], [], []>} : vector<8x32xf32>, vector<32x128xf32>, vector<8x128xf32> -> vector<8x128xf32>
    %c0_59 = arith.constant 0 : index
    %c0_60 = arith.constant 0 : index
    %157 = vector.load %arg10[%c0_59, %c0_60] : memref<1x128xf32, #tpu.memory_space<vmem>>, vector<1x128xf32>
    %158 = vector.broadcast %157 : vector<1x128xf32> to vector<8x128xf32>
    %159 = arith.addf %156, %158 : vector<8x128xf32>
    %cst_61 = arith.constant 0.000000e+00 : f32
    %160 = vector.broadcast %cst_61 : f32 to vector<8x128xf32>
    %161 = arith.maximumf %159, %160 : vector<8x128xf32>
    %c0_62 = arith.constant 0 : index
    %c0_63 = arith.constant 0 : index
    %162 = vector.load %arg11[%c0_62, %c0_63] : memref<128x32xf32, #tpu.memory_space<vmem>>, vector<128x32xf32>
    %cst_64 = arith.constant dense<0.000000e+00> : vector<8x32xf32>
    %163 = tpu.matmul %161, %162, %cst_64 {dimension_numbers = #tpu.dot_dimension_numbers<[1], [0], [0], [1], [0, 0, 1, 1], [], []>} : vector<8x128xf32>, vector<128x32xf32>, vector<8x32xf32> -> vector<8x32xf32>
    %c0_65 = arith.constant 0 : index
    %c0_66 = arith.constant 0 : index
    %164 = vector.load %arg12[%c0_65, %c0_66] : memref<1x32xf32, #tpu.memory_space<vmem>>, vector<1x32xf32>
    %165 = vector.broadcast %164 : vector<1x32xf32> to vector<8x32xf32>
    %166 = arith.addf %163, %165 : vector<8x32xf32>
    %167 = arith.addf %130, %166 : vector<8x32xf32>
    %168 = vector.shape_cast %167 : vector<8x32xf32> to vector<1x8x32xf32>
    %c0_67 = arith.constant 0 : index
    %c0_68 = arith.constant 0 : index
    %c0_69 = arith.constant 0 : index
    %169 = vector.load %arg13[%c0_67, %c0_68, %c0_69] : memref<1x8x32xf32, #tpu.memory_space<vmem>>, vector<1x8x32xf32>
    tpu.vector_store %arg13[%c0_67, %c0_68, %c0_69], %168 {strides = array<i32>} : memref<1x8x32xf32, #tpu.memory_space<vmem>>, vector<1x8x32xf32>,
    return
  }
  func.func @transform_0(%arg0: i32) -> (i32, i32, i32) {
    %c0_i32 = arith.constant 0 : i32
    %c0_i32_0 = arith.constant 0 : i32
    %c0_i32_1 = arith.constant 0 : i32
    return %arg0, %c0_i32, %c0_i32_0 : i32, i32, i32
  }
  func.func @transform_1(%arg0: i32) -> (i32, i32) {
    %c0_i32 = arith.constant 0 : i32
    %c0_i32_0 = arith.constant 0 : i32
    %c0_i32_1 = arith.constant 0 : i32
    return %c0_i32, %c0_i32_0 : i32, i32
  }
  func.func @transform_2(%arg0: i32) -> (i32, i32) {
    %c0_i32 = arith.constant 0 : i32
    %c0_i32_0 = arith.constant 0 : i32
    %c0_i32_1 = arith.constant 0 : i32
    return %c0_i32, %c0_i32_0 : i32, i32
  }
  func.func @transform_3(%arg0: i32) -> (i32, i32) {
    %c0_i32 = arith.constant 0 : i32
    %c0_i32_0 = arith.constant 0 : i32
    %c0_i32_1 = arith.constant 0 : i32
    return %c0_i32, %c0_i32_0 : i32, i32
  }
  func.func @transform_4(%arg0: i32) -> (i32, i32) {
    %c0_i32 = arith.constant 0 : i32
    %c0_i32_0 = arith.constant 0 : i32
    %c0_i32_1 = arith.constant 0 : i32
    return %c0_i32, %c0_i32_0 : i32, i32
  }
  func.func @transform_5(%arg0: i32) -> (i32, i32) {
    %c0_i32 = arith.constant 0 : i32
    %c0_i32_0 = arith.constant 0 : i32
    %c0_i32_1 = arith.constant 0 : i32
    return %c0_i32, %c0_i32_0 : i32, i32
  }
  func.func @transform_6(%arg0: i32) -> (i32, i32) {
    %c0_i32 = arith.constant 0 : i32
    %c0_i32_0 = arith.constant 0 : i32
    %c0_i32_1 = arith.constant 0 : i32
    return %c0_i32, %c0_i32_0 : i32, i32
  }
  func.func @transform_7(%arg0: i32) -> (i32, i32) {
    %c0_i32 = arith.constant 0 : i32
    %c0_i32_0 = arith.constant 0 : i32
    %c0_i32_1 = arith.constant 0 : i32
    return %c0_i32, %c0_i32_0 : i32, i32
  }
  func.func @transform_8(%arg0: i32) -> (i32, i32) {
    %c0_i32 = arith.constant 0 : i32
    %c0_i32_0 = arith.constant 0 : i32
    %c0_i32_1 = arith.constant 0 : i32
    return %c0_i32, %c0_i32_0 : i32, i32
  }
  func.func @transform_9(%arg0: i32) -> (i32, i32) {
    %c0_i32 = arith.constant 0 : i32
    %c0_i32_0 = arith.constant 0 : i32
    %c0_i32_1 = arith.constant 0 : i32
    return %c0_i32, %c0_i32_0 : i32, i32
  }
  func.func @transform_10(%arg0: i32) -> (i32, i32) {
    %c0_i32 = arith.constant 0 : i32
    %c0_i32_0 = arith.constant 0 : i32
    %c0_i32_1 = arith.constant 0 : i32
    return %c0_i32, %c0_i32_0 : i32, i32
  }
  func.func @transform_11(%arg0: i32) -> (i32, i32) {
    %c0_i32 = arith.constant 0 : i32
    %c0_i32_0 = arith.constant 0 : i32
    %c0_i32_1 = arith.constant 0 : i32
    return %c0_i32, %c0_i32_0 : i32, i32
  }
  func.func @transform_12(%arg0: i32) -> (i32, i32, i32) {
    %c0_i32 = arith.constant 0 : i32
    %c0_i32_0 = arith.constant 0 : i32
    %c0_i32_1 = arith.constant 0 : i32
    return %arg0, %c0_i32, %c0_i32_0 : i32, i32, i32
  }
}

</mosaic_0001>

<bundles_post_ra>
// kernel: transformer_forward.9
= control target key start
LH: loop header
LB: loop body
LE: loop exit
PB: predicated region body
PF: predicated region fallthrough
CT: control target
= control target key end

     0   :  { %10 = vsyncpa [#allocation3], 0  ;;  %s759_s0 = inlined_call_operand.vmem [shape: f32[2,8,32], index: 0, kind: input, shape index: {}]   ;;  %s760_s1 = inlined_call_operand.vmem [shape: f32[1,32], index: 1, kind: input, shape index: {}]   ;;  %s761_s2 = inlined_call_operand.vmem [shape: f32[1,32], index: 2, kind: input, shape index: {}]   ;;  %s762_s3 = inlined_call_operand.vmem [shape: f32[32,128], index: 3, kind: input, shape index: {}]   ;;  %s763_s4 = inlined_call_operand.vmem [shape: f32[1,128], index: 4, kind: input, shape index: {}]   ;;  %s764_s5 = inlined_call_operand.hbm [shape: f32[2,8,128], index: 5, kind: output, shape index: {}]  }
   0x1   :  { %12 = vsyncpa [#allocation3 + $0x1], 0  ;;  %s638_s18 = smov 0   ;;  %s640_s19 = smov 0  }
   0x2   :  { %s642_s20 = smov 0   ;;  %s644_s21 = smov 0  }
   0x3   :  { %s646_s22 = smov 0   ;;  %s648_s23 = smov 0  }
   0x4 LB: > { %s450_s24 = sadd.s32 4294967295, %s605_s23   ;;  %s451_s25 = sadd.s32 4294967294, %s605_s23   ;;  %s605_s23 = sphi %s648_s23, %s18_s23   ;;  %s601_s22 = sphi %s646_s22, %s771_s22   ;;  %s597_s21 = sphi %s644_s21, %s770_s21   ;;  %s593_s20 = sphi %s642_s20, %s769_s20   ;;  %s589_s19 = sphi %s640_s19, %s768_s19   ;;  %s585_s18 = sphi %s638_s18, %s767_s18  }
   0x5   : > { %s30_s26 = sadd.s32 1, %s601_s22  ;;  %s159_s27 = sadd.s32 1, %s593_s20 }
   0x6   : > { %p32_p0 = scmp.ge.s32.totalorder %s30_s26, 2  ;;  %p169_p1 = scmp.ne.s32.totalorder %s593_s20, %s589_s19 }
   0x7   : > { %p170_p2 = scmp.eq.s32.totalorder %s450_s24, 1  ;;  %p175_p3 = scmp.ne.s32.totalorder %s589_s19, %s585_s18 }
   0x8   : > { %s773_s26 = smov (%p32_p0, %s30_s26), 0  ;;  %p176_p5 = scmp.eq.s32.totalorder %s451_s25, 1 }
   0x9   : > { %p678_p4 = por %p170_p2, %p169_p1  ;;  %s154_s29 = ssub.s32 %s601_s22, %s773_s26 }
   0xa   : > { %p456_p6 = scmp.ge.s32.totalorder %s605_s23, 1  ;;  %p157_p7 = scmp.eq.s32.totalorder %s154_s29, 0 }
   0xb   : > { %p685_p8 = por %p176_p5, %p175_p3  ;;  %p220_p9 = scmp.lt.s32.totalorder %s605_s23, 3 }
   0xc   : > { %s691_s6 = scalar_select %p157_p7, %s593_s20, %s159_s27  }
   0xd   : > { %p221_p10 = pnand %p456_p6, %p220_p9 }
   0xe   : > { %p254_p11 = scmp.lt.s32.totalorder (!%p221_p10), %s597_s21, 1  ;;  %s251_s9 = sand.u32 (!%p221_p10), 1, %s589_s19  }
   0xf   : > { %224 = sbr.rel (%p221_p10) target bundleno = 424 (0x1a8), region = 40  ;;  %s457_s10 = sshll.u32 (!%p221_p10), %s251_s9, 3 }
  0x10   : > { %s253_s17 = scalar_lea.vmem (!%p221_p10), [#allocation2], %s457_s10  ;;  %s339_s27 = scalar_lea.sflag (!%p221_p10), [#allocation3], %s251_s9 }
  0x11   : > { %s352_s24 = sshll.u32 (!%p221_p10), %s253_s17, 4  ;;  %s353_s24 = int_to_ptr.vmem [resolvable:$true] %s352_s24 }
  0x14   : > { %s255_s7 = scalar_select %p254_p11, %s597_s21, 1  ;;  %vm268_vm0 = vcmask 261120   ;;  %v607_v2 = vmov 32.0   ;;  %v309_v14 = vld [vmem:[%s762_s3 + $0x18] sm:$0xff]  ;;  %v308_v15 = vld [vmem:[%s762_s3 + $0x10] sm:$0xff]  ;;  %v307_v16 = vld [vmem:[%s762_s3 + $0x8] sm:$0xff] }
  0x15   : > { %523 = vrcp.f32 %v607_v2  ;;  %329 = vmatpush.msra.mxu0 %v309_v14  ;;  %v306_v17 = vld [vmem:[%s762_s3] sm:$0xff] }
  0x16   : > { %s458_s8 = sshll.u32 %s255_s7, 3  ;;  %v520_v27 = vld [vmem:[%s760_s1] ss:$0 sm:$0xff] }
  0x17   : > { %s257_s11 = scalar_lea.vmem %s759_s0, %s458_s8  ;;  %330 = vmatpush.msra.mxu0 %v308_v15  ;;  %v521_v30 = vld [vmem:[%s761_s2] ss:$0 sm:$0xff] }
  0x18   : > { %v265_v0 = vld [vmem:[%s257_s11] sm:$0xff]  ;;  %s461_s11 = sshll.u32 %s597_s21, 3 }
  0x19   : > { %v269_v1 = vsel %vm268_vm0, %v265_v0, 0.0  ;;  %331 = vmatpush.msra.mxu0 %v307_v16  ;;  %s350_s14 = scalar_lea.hbm %s764_s5, %s461_s11  ;;  %v522_v33 = vld [vmem:[%s763_s4] ss:$0 sm:$0xff]  ;;  %s547_s11 = scalar_lea.hbm %s764_s5, 16 }
  0x1a   : > { %270 = vadd.xlane.f32.xlu0 %v269_v1  ;;  %s354_s25 = sshll.u32 %s350_s14, 4  ;;  %s355_s25 = int_to_ptr.hbm [resolvable:$true] %s354_s25 }
  0x1b   : > { %v524_v3 = vpop.eup %523  ;;  %332 = vmatpush.msra.mxu0 %v306_v17  ;;  %s541_s29 = sshra.s32 %s355_s25, 4  ;;  %s542_s29 = int_to_ptr.hbm [resolvable:$true] %s541_s29 }
  0x1c   : > { %v273_v4 = vmul.f32 32.0, %v524_v3  ;;  %vm277_vm1 = vweird.f32 %v524_v3  ;;  %s543_s21 = scalar_lea.hbm %s542_s29, 8  ;;  %p548_p1 = scmp.lt.s32.totalorder %s542_s29, %s764_s5 }
  0x1d   : > { %p544_p12 = scmp.ne.s32.totalorder %s542_s29, %s543_s21  ;;  %p549_p2 = scmp.lt.s32.totalorder %s547_s11, %s543_s21 }
  0x1e   : > { %v274_v5 = vsub.f32 1.0, %v273_v4 }
  0x1f   : > { %p545_p13 = pnand %p544_p12, %p678_p4  ;;  %p550_p3 = por %p549_p2, %p548_p1 }
  0x20   : > { %v275_v6 = vmul.f32 %v524_v3, %v274_v5 }
  0x21   : > { %p546_p0 = pneg %p545_p13 }
  0x22   : > { %v276_v7 = vadd.f32 %v524_v3, %v275_v6 }
  0x23   : > { %p551_p5 = pnand %p550_p3, %p546_p0 }
  0x24   : > { %v278_v8 = vsel %vm277_vm1, %v524_v3, %v276_v7 }
  0x8d   : > { %v271_v9 = vpop.xlane.xlu0 %270 }
  0x8e   : > { %v279_v10 = vmul.f32 %v278_v8, %v271_v9 }
  0x90   : > { %v280_v11 = vsub.f32 %v265_v0, %v279_v10 }
  0x92   : > { %v281_v12 = vmul.f32 %v280_v11, %v280_v11 }
  0x94   : > { %v282_v13 = vsel %vm268_vm0, %v281_v12, 0.0 }
  0x95   : > { %283 = vadd.xlane.f32.xlu0 %v282_v13 }
 0x108   : > { %v284_v18 = vpop.xlane.xlu0 %283 }
 0x109   : > { %v285_v19 = vmul.f32 %v284_v18, %v278_v8 }
 0x10b   : > { %v286_v20 = vadd.f32 1e-05, %v285_v19 }
 0x10d   : > { %525 = vrsqrt.f32 %v286_v20  ;;  %vm293_vm3 = vweird.f32 %v286_v20 }
 0x113   : > { %v526_v21 = vpop.eup %525 }
 0x114   : > { %v288_v22 = vmul.f32 %v526_v21, %v286_v20  ;;  %vm294_vm2 = vweird.f32 %v526_v21 }
 0x115   : > { %vm295_vm4 = vmor %vm293_vm3, %vm294_vm2 }
 0x116   : > { %v289_v23 = vmul.f32 %v526_v21, %v288_v22 }
 0x118   : > { %v290_v24 = vmul.f32 0.5, %v289_v23 }
 0x11a   : > { %v291_v25 = vsub.f32 1.5, %v290_v24 }
 0x11c   : > { %v292_v26 = vmul.f32 %v526_v21, %v291_v25 }
 0x11e   : > { %v296_v28 = vsel %vm295_vm4, %v526_v21, %v292_v26 }
 0x11f   : > { %v297_v29 = vmul.f32 %v296_v28, %v280_v11 }
 0x121   : > { %v301_v31 = vmul.f32 %v520_v27, %v297_v29 }
 0x123   : > { %v305_v32 = vadd.f32 %v521_v30, %v301_v31 }
 0x125   : > { %459 = vmatmul.msk.f32.vlgmr.msra.gmra.mxu0 %vm268_vm0, %v305_v32 }
 0x1a2   : > { %v334_v34 = vpop.f32.mrf.mxu0 }
 0x1a3   : > { %v335_v35 = vadd.f32 %v522_v33, %v334_v34 }
 0x1a5   : > { %337 = vst [vmem:[%s253_s17] sm:$0xff] %v335_v35 }
 0x1a6   : > { %554 = shalt.err (!%p551_p5)
}
 0x1a7   : > { %464 = dma.vmem_to_hbm [thread:$0]  (%p678_p4), %s353_s24, 128, %s355_s25, %s339_s27  }
 0x1a8 PF: > { %p470_p6 = scmp.ge.s32.totalorder %s605_s23, 2  ;;  %s366_s9 = sand.u32 1, %s585_s18  }
 0x1a9   : > { %s367_s13 = scalar_lea.sflag [#allocation3], %s366_s9 }
 0x1aa   : > { %p467_p7 = pnand %p470_p6, %p685_p8 }
 0x1ac   : > { %p468_p9 = pneg %p467_p7 }
 0x1ae   : > { %580 = dma.done.wait (%p468_p9), %s367_s13, 128  }
 0x1af   : > { %582 = vsyncadd (%p468_p9), %s367_s13, 4294967168  ;;  %s18_s23 = sadd.s32 1, %s605_s23   ;;  %s767_s18 = smov %s589_s19 }
 0x1b0   : > { %p15_p10 = scmp.ge.s32.totalorder %s18_s23, 4   ;;  %s768_s19 = smov %s593_s20 }
 0x1b1   : > { %s769_s20 = smov %s691_s6  ;;  %s770_s21 = smov %s601_s22 }
 0x1b2   : > { %s771_s22 = smov %s773_s26  ;;  %17 = sbr.rel (!%p15_p10) target bundleno = 4 (0x4), region = 81 }
 0x1b7   :  { %373 = vsyncpa [#allocation3], 1 }
 0x1b8   :  { %375 = vsyncpa [#allocation3 + $0x1], 1 }

// kernel: transformer_forward.5
= control target key start
LH: loop header
LB: loop body
LE: loop exit
PB: predicated region body
PF: predicated region fallthrough
CT: control target
= control target key end

     0   :  { %s1128_s21 = smov 0   ;;  %s1316_s0 = inlined_call_operand.vmem [shape: f32[2,8,32], index: 0, kind: input, shape index: {}]   ;;  %s1317_s1 = inlined_call_operand.vmem [shape: f32[1,32], index: 1, kind: input, shape index: {}]   ;;  %s1318_s2 = inlined_call_operand.vmem [shape: f32[1,32], index: 2, kind: input, shape index: {}]   ;;  %s1319_s3 = inlined_call_operand.vmem [shape: f32[32,96], index: 3, kind: input, shape index: {}]   ;;  %s1320_s4 = inlined_call_operand.vmem [shape: f32[32,32], index: 4, kind: input, shape index: {}]   ;;  %s1321_s5 = inlined_call_operand.vmem [shape: f32[1,32], index: 5, kind: input, shape index: {}]   ;;  %s1322_s6 = inlined_call_operand.vmem [shape: f32[1,32], index: 6, kind: input, shape index: {}]   ;;  %s1323_s7 = inlined_call_operand.vmem [shape: f32[1,32], index: 7, kind: input, shape index: {}]   ;;  %s1324_s8 = inlined_call_operand.vmem [shape: f32[32,128], index: 8, kind: input, shape index: {}]   ;;  %s1325_s9 = inlined_call_operand.vmem [shape: f32[1,128], index: 9, kind: input, shape index: {}]   ;;  %s1326_s10 = inlined_call_operand.vmem [shape: f32[128,32], index: 10, kind: input, shape index: {}]   ;;  %s1327_s11 = inlined_call_operand.vmem [shape: f32[1,32], index: 11, kind: input, shape index: {}]   ;;  %s1328_s12 = inlined_call_operand.vmem [shape: f32[2,8,32], index: 12, kind: output, shape index: {}]  }
   0x1 LB: > { %s962_s22 = sadd.s32 4294967295, %s1045_s21   ;;  %p966_p0 = scmp.ge.s32.totalorder %s1045_s21, 1  ;;  %s1045_s21 = sphi %s1128_s21, %s22_s21  }
   0x2   : > { %p361_p1 = scmp.lt.s32.totalorder %s1045_s21, 3 }
   0x4   : > { %p362_p2 = pnand %p966_p0, %p361_p1 }
   0x5   : > { %p401_p3 = scmp.lt.s32.totalorder (!%p362_p2), %s962_s22, 1  ;;  %s1048_s24 = smov (!%p362_p2), 112  }
   0x6   : > { %365 = sbr.rel (%p362_p2) target bundleno = 1861 (0x745), region = 68  ;;  %s1049_s25 = smov (!%p362_p2), 120  }
   0x7   : > { %s1051_s27 = smov (!%p362_p2), 80   ;;  %s1052_s28 = smov (!%p362_p2), 88  }
   0x8   : > { %s1053_s29 = smov (!%p362_p2), 104   ;;  %s1054_s30 = smov (!%p362_p2), 72  }
   0x9   : > { %s1056_s13 = smov (!%p362_p2), 64   ;;  %s1057_s14 = smov (!%p362_p2), 40  }
   0xa   : > { %s1058_s15 = smov (!%p362_p2), 56   ;;  %s1059_s16 = smov (!%p362_p2), 48  }
   0xb   : > { %s1330_s22 = smov (!%p401_p3, %s962_s22), 1  ;;  %vm412_vm0 = vcmask 261120   ;;  %v1047_v2 = vmov 32.0   ;;  %v453_v14 = vld [vmem:[%s1319_s3 + $0x18] sm:$0xff]  ;;  %v452_v15 = vld [vmem:[%s1319_s3 + $0x10] sm:$0xff]  ;;  %v451_v16 = vld [vmem:[%s1319_s3 + $0x8] sm:$0xff]  ;;  %v477_v41 = vlaneseq }
   0xc   : > { %s967_s23 = sshll.u32 %s1330_s22, 3  ;;  %1017 = vrcp.f32 %v1047_v2  ;;  %469 = vmatpush.msra.mxu2 %v453_v14  ;;  %v450_v17 = vld [vmem:[%s1319_s3] sm:$0xff]  ;;  %vm486_vm5 = vcmask 64512   ;;  %v1055_v45 = vmov -1e+30   ;;  %s1060_s17 = smov 8  }
   0xd   : > { %s404_s26 = scalar_lea.vmem %s1316_s0, %s967_s23  ;;  %v1010_v27 = vld [vmem:[%s1317_s1] ss:$0 sm:$0xff]  ;;  %v478_v42 = vshrl.u32 %v477_v41, 7  ;;  %v480_v43 = vand.u32 127, %v477_v41  ;;  %s1061_s18 = smov 16   ;;  %v773_v41 = vld [vmem:[%s1320_s4 + $0x10] sm:$0xff] }
   0xe   : > { %v1144_v0 = vld [vmem:[%s404_s26] sm:$0xff]  ;;  %470 = vmatpush.msra.mxu2 %v452_v15  ;;  %s1050_s26 = smov 96   ;;  %s1062_s19 = smov 24   ;;  %vm622_vm7 = vcmask 130112   ;;  %vm695_vm8 = vcmask 195712   ;;  %vm768_vm9 = vcmask 261312  }
   0xf   : > { %v413_v1 = vsel %vm412_vm0, %v1144_v0, 0.0  ;;  %v1011_v30 = vld [vmem:[%s1318_s2] ss:$0 sm:$0xff]  ;;  %vm481_vm6 = vcmp.ge.s32.totalorder %v478_v42, %v480_v43  ;;  %v772_v42 = vld [vmem:[%s1320_s4 + $0x8] sm:$0xff]  ;;  %s408_s20 = scalar_lea.vmem %s1328_s12, %s967_s23 }
  0x10   : > { %414 = vadd.xlane.f32.xlu0 %v413_v1  ;;  %471 = vmatpush.msra.mxu2 %v451_v16  ;;  %v482_v46 = vsel %vm481_vm6, 0.0, %v1055_v45  ;;  %v771_v43 = vld [vmem:[%s1320_s4] sm:$0xff] }
  0x12   : > { %v1018_v3 = vpop.eup %1017  ;;  %472 = vmatpush.msra.mxu2 %v450_v17 }
  0x13   : > { %v417_v4 = vmul.f32 32.0, %v1018_v3  ;;  %vm421_vm1 = vweird.f32 %v1018_v3 }
  0x15   : > { %v418_v5 = vsub.f32 1.0, %v417_v4 }
  0x17   : > { %v419_v6 = vmul.f32 %v1018_v3, %v418_v5 }
  0x19   : > { %v420_v7 = vadd.f32 %v1018_v3, %v419_v6 }
  0x1b   : > { %v1148_v8 = vsel %vm421_vm1, %v1018_v3, %v420_v7 }
  0x83   : > { %v415_v9 = vpop.xlane.xlu0 %414 }
  0x84   : > { %v423_v10 = vmul.f32 %v1148_v8, %v415_v9 }
  0x86   : > { %v424_v11 = vsub.f32 %v1144_v0, %v423_v10 }
  0x88   : > { %v425_v12 = vmul.f32 %v424_v11, %v424_v11 }
  0x8a   : > { %v426_v13 = vsel %vm412_vm0, %v425_v12, 0.0 }
  0x8b   : > { %427 = vadd.xlane.f32.xlu0 %v426_v13 }
  0xfe   : > { %v428_v18 = vpop.xlane.xlu0 %427 }
  0xff   : > { %v429_v19 = vmul.f32 %v428_v18, %v1148_v8 }
 0x101   : > { %v430_v20 = vadd.f32 1e-05, %v429_v19 }
 0x103   : > { %1019 = vrsqrt.f32 %v430_v20  ;;  %vm437_vm3 = vweird.f32 %v430_v20 }
 0x109   : > { %v1020_v21 = vpop.eup %1019 }
 0x10a   : > { %v432_v22 = vmul.f32 %v1020_v21, %v430_v20  ;;  %vm438_vm2 = vweird.f32 %v1020_v21 }
 0x10b   : > { %vm439_vm4 = vmor %vm437_vm3, %vm438_vm2 }
 0x10c   : > { %v433_v23 = vmul.f32 %v1020_v21, %v432_v22 }
 0x10e   : > { %v434_v24 = vmul.f32 0.5, %v433_v23 }
 0x110   : > { %v435_v25 = vsub.f32 1.5, %v434_v24 }
 0x112   : > { %v436_v26 = vmul.f32 %v1020_v21, %v435_v25 }
 0x114   : > { %v440_v28 = vsel %vm439_vm4, %v1020_v21, %v436_v26 }
 0x115   : > { %v441_v29 = vmul.f32 %v440_v28, %v424_v11 }
 0x117   : > { %v445_v31 = vmul.f32 %v1010_v27, %v441_v29 }
 0x119   : > { %v449_v32 = vadd.f32 %v1011_v30, %v445_v31 }
 0x11b   : > { %969 = vmatmul.msk.f32.vlgmr.msra.gmra.mxu2 %vm412_vm0, %v449_v32 }
 0x19e   : > { %v1173_v33 = vpop.f32.mrf.mxu2 }
 0x19f   : > { %624 = vrot.lane.b32.xlu0 %v1173_v33, %s1048_s24  ;;  %551 = vrot.lane.b32.xlu2 %v1173_v33, %s1049_s25 }
 0x1a0   : > { %484 = vrot.lane.b32.xlu1 %v1173_v33, %s1050_s26 }
 0x1a7   : > { %626 = vrot.lane.b32.xlu2 %v1173_v33, %s1051_s27 }
 0x1a8   : > { %553 = vrot.lane.b32.xlu1 %v1173_v33, %s1052_s28 }
 0x1af   : > { %697 = vrot.lane.b32.xlu2 %v1173_v33, %s1053_s29 }
 0x1b0   : > { %699 = vrot.lane.b32.xlu1 %v1173_v33, %s1054_s30 }
 0x1f9   : > { %v552_v34 = vpop.permute.xlu2 %551 }
 0x201   : > { %v627_v36 = vpop.permute.xlu2 %626 }
 0x209   : > { %v698_v40 = vpop.permute.xlu2 %697 }
 0x211   : > { %v625_v38 = vpop.permute.xlu0 %624 }
 0x212   : > { %v485_v35 = vpop.permute.xlu1 %484 }
 0x213   : > { %970 = vmatpush.xpose.msk.msra.mxu1 %vm486_vm5, %v485_v35 }
 0x216   : > { %971 = vmatmul.msk.f32.vlgmr.msra.gmra.mxu1 %vm486_vm5, %v1173_v33 }
 0x217   : > { %976 = vmatpush.xpose.msk.msrb.mxu1 %vm486_vm5, %v627_v36 }
 0x21a   : > { %v554_v37 = vpop.permute.xlu1 %553 }
 0x21b   : > { %973 = vmatpush.xpose.msk.msra.mxu3 %vm486_vm5, %v554_v37 }
 0x21e   : > { %974 = vmatmul.msk.f32.vlgmr.msra.gmra.mxu3 %vm486_vm5, %v552_v34  ;;  %977 = vmatmul.msk.f32.vlgmr.msrb.gmra.mxu1 %vm486_vm5, %v625_v38 }
 0x222   : > { %v700_v39 = vpop.permute.xlu1 %699 }
 0x223   : > { %979 = vmatpush.xpose.msk.msra.mxu1 %vm486_vm5, %v700_v39 }
 0x226   : > { %980 = vmatmul.msk.f32.vlgmr.msra.gmra.mxu1 %vm486_vm5, %v698_v40  ;;  %v774_v40 = vld [vmem:[%s1320_s4 + $0x18] sm:$0xff] }
 0x227   : > { %794 = vmatpush.msrb.mxu1 %v774_v40 }
 0x229   : > { %795 = vmatpush.msrb.mxu1 %v773_v41 }
 0x22b   : > { %796 = vmatpush.msrb.mxu1 %v772_v42 }
 0x22d   : > { %797 = vmatpush.msrb.mxu1 %v771_v43 }
 0x293   : > { %v508_v44 = vpop.f32.mrf.mxu1 }
 0x294   : > { %v511_v47 = vmul.f32 0.35355338, %v508_v44 }
 0x296   : > { %v512_v48 = vadd.f32 %v511_v47, %v482_v46 }
 0x298   : > { %v513_v49 = vsel %vm486_vm5, %v512_v48, -inf }
 0x299   : > { %514 = vmax.xlane.f32.xlu1 %v513_v49 }
 0x29b   : > { %v649_v50 = vpop.f32.mrf.mxu1 }
 0x29c   : > { %v652_v51 = vmul.f32 0.35355338, %v649_v50 }
 0x29e   : > { %v653_v52 = vadd.f32 %v652_v51, %v482_v46 }
 0x2a0   : > { %v654_v53 = vsel %vm486_vm5, %v653_v52, -inf }
 0x2a1   : > { %655 = vmax.xlane.f32.xlu0 %v654_v53  ;;  %v576_v54 = vpop.f32.mrf.mxu3 }
 0x2a2   : > { %v579_v55 = vmul.f32 0.35355338, %v576_v54 }
 0x2a3   : > { %v722_v56 = vpop.f32.mrf.mxu1 }
 0x2a4   : > { %v580_v57 = vadd.f32 %v579_v55, %v482_v46  ;;  %v725_v58 = vmul.f32 0.35355338, %v722_v56 }
 0x2a6   : > { %v581_v59 = vsel %vm486_vm5, %v580_v57, -inf  ;;  %v726_v60 = vadd.f32 %v725_v58, %v482_v46  ;;  %v838_v58 = vld [vmem:[%s1324_s8 + $0x18] sm:$0xff] }
 0x2a7   : > { %582 = vmax.xlane.f32.xlu2 %v581_v59  ;;  %v836_v59 = vld [vmem:[%s1324_s8 + $0x8] sm:$0xff] }
 0x2a8   : > { %v727_v61 = vsel %vm486_vm5, %v726_v60, -inf }
 0x2af   : > { %728 = vmax.xlane.f32.xlu2 %v727_v61  ;;  %v882_v61 = vld [vmem:[%s1326_s10 + $0x78] sm:$0xff] }
 0x2b0   : > { %887 = vmatpush.msra.mxu0 %v882_v61 }
 0x2b2   : > { %524 = vrot.lane.b32.xlu1 %v1173_v33, %s1056_s13 }
 0x30c   : > { %v515_v62 = vpop.xlane.xlu1 %514 }
 0x30d   : > { %v516_v63 = vsub.f32 %v512_v48, %v515_v62  ;;  %v1012_v48 = vld [vmem:[%s1321_s5] ss:$0 sm:$0xff]  ;;  %v881_v62 = vld [vmem:[%s1326_s10 + $0x70] sm:$0xff] }
 0x30e   : > { %888 = vmatpush.msra.mxu0 %v881_v62 }
 0x30f   : > { %v517_v1 = vmul.f32 1.442695, %v516_v63  ;;  %v880_v63 = vld [vmem:[%s1326_s10 + $0x68] sm:$0xff] }
 0x310   : > { %889 = vmatpush.msra.mxu0 %v880_v63 }
 0x311   : > { %1021 = vpow2.f32 %v517_v1 }
 0x314   : > { %v656_v2 = vpop.xlane.xlu0 %655 }
 0x315   : > { %v657_v3 = vsub.f32 %v653_v52, %v656_v2 }
 0x317   : > { %v1022_v4 = vpop.eup %1021  ;;  %v658_v5 = vmul.f32 1.442695, %v657_v3  ;;  %v879_v3 = vld [vmem:[%s1326_s10 + $0x60] sm:$0xff] }
 0x318   : > { %v519_v6 = vsel %vm486_vm5, %v1022_v4, 0.0  ;;  %890 = vmatpush.msra.mxu0 %v879_v3 }
 0x319   : > { %1023 = vpow2.f32 %v658_v5  ;;  %520 = vadd.xlane.f32.xlu1 %v519_v6  ;;  %v878_v5 = vld [vmem:[%s1326_s10 + $0x58] sm:$0xff]  ;;  %v877_v6 = vld [vmem:[%s1326_s10 + $0x50] sm:$0xff] }
 0x31a   : > { %v583_v7 = vpop.xlane.xlu2 %582  ;;  %891 = vmatpush.msra.mxu0 %v878_v5 }
 0x31b   : > { %v584_v9 = vsub.f32 %v580_v57, %v583_v7  ;;  %v875_v7 = vld [vmem:[%s1326_s10 + $0x40] sm:$0xff] }
 0x31c   : > { %892 = vmatpush.msra.mxu0 %v877_v6 }
 0x31d   : > { %v585_v10 = vmul.f32 1.442695, %v584_v9 }
 0x31f   : > { %v1024_v11 = vpop.eup %1023  ;;  %1025 = vpow2.f32 %v585_v10  ;;  %v874_v10 = vld [vmem:[%s1326_s10 + $0x38] sm:$0xff] }
 0x320   : > { %v660_v12 = vsel %vm486_vm5, %v1024_v11, 0.0 }
 0x321   : > { %661 = vadd.xlane.f32.xlu0 %v660_v12  ;;  %v873_v12 = vld [vmem:[%s1326_s10 + $0x30] sm:$0xff] }
 0x322   : > { %v729_v13 = vpop.xlane.xlu2 %728 }
 0x323   : > { %v730_v14 = vsub.f32 %v726_v60, %v729_v13  ;;  %v835_v60 = vld [vmem:[%s1324_s8] sm:$0xff] }
 0x324   : > { %v525_v15 = vpop.permute.xlu1 %524 }
 0x325   : > { %v1026_v16 = vpop.eup %1025  ;;  %v731_v17 = vmul.f32 1.442695, %v730_v14  ;;  %545 = vmatpush.msrb.mxu2 %v525_v15  ;;  %v872_v14 = vld [vmem:[%s1326_s10 + $0x28] sm:$0xff] }
 0x326   : > { %v587_v18 = vsel %vm486_vm5, %v1026_v16, 0.0 }
 0x327   : > { %1027 = vpow2.f32 %v731_v17  ;;  %588 = vadd.xlane.f32.xlu2 %v587_v18  ;;  %v870_v18 = vld [vmem:[%s1326_s10 + $0x18] sm:$0xff] }
 0x32d   : > { %v1028_v19 = vpop.eup %1027 }
 0x32e   : > { %v733_v20 = vsel %vm486_vm5, %v1028_v19, 0.0 }
 0x32f   : > { %734 = vadd.xlane.f32.xlu2 %v733_v20  ;;  %v1013_v20 = vld [vmem:[%s1322_s6] ss:$0 sm:$0xff] }
 0x332   : > { %738 = vrot.lane.b32.xlu1 %v1173_v33, %s1057_s14 }
 0x335   : > { %592 = vrot.lane.b32.xlu0 %v1173_v33, %s1058_s15 }
 0x347   : > { %665 = vrot.lane.b32.xlu2 %v1173_v33, %s1059_s16 }
 0x38c   : > { %v521_v21 = vpop.xlane.xlu1 %520 }
 0x38d   : > { %1029 = vrcp.f32 %v521_v21 }
 0x393   : > { %v1030_v22 = vpop.eup %1029 }
 0x394   : > { %v523_v23 = vmul.f32 %v1030_v22, %v1022_v4  ;;  %v662_v25 = vpop.xlane.xlu0 %661 }
 0x396   : > { %972 = vmatmul.msk.f32.vlgmr.msrb.gmra.mxu2 %vm486_vm5, %v523_v23  ;;  %v1014_v23 = vld [vmem:[%s1323_s7] ss:$0 sm:$0xff] }
 0x39a   : > { %v589_v24 = vpop.xlane.xlu2 %588 }
 0x39b   : > { %1031 = vrcp.f32 %v589_v24 }
 0x39c   : > { %1033 = vrcp.f32 %v662_v25 }
 0x3a1   : > { %v1032_v27 = vpop.eup %1031 }
 0x3a2   : > { %v735_v26 = vpop.xlane.xlu2 %734  ;;  %v1034_v28 = vpop.eup %1033  ;;  %v591_v29 = vmul.f32 %v1032_v27, %v1026_v16  ;;  %v871_v16 = vld [vmem:[%s1326_s10 + $0x20] sm:$0xff]  ;;  %v868_v27 = vld [vmem:[%s1326_s10 + $0x8] sm:$0xff] }
 0x3a3   : > { %1035 = vrcp.f32 %v735_v26  ;;  %v664_v33 = vmul.f32 %v1034_v28, %v1024_v11  ;;  %v869_v26 = vld [vmem:[%s1326_s10 + $0x10] sm:$0xff]  ;;  %v867_v28 = vld [vmem:[%s1326_s10] sm:$0xff] }
 0x3a4   : > { %v739_v31 = vpop.permute.xlu1 %738 }
 0x3a7   : > { %v593_v30 = vpop.permute.xlu0 %592 }
 0x3a8   : > { %613 = vmatpush.msra.mxu2 %v593_v30 }
 0x3a9   : > { %975 = vmatmul.msk.f32.vlgmr.msra.gmra.mxu2 %vm486_vm5, %v591_v29  ;;  %v1036_v34 = vpop.eup %1035  ;;  %v1015_v29 = vld [vmem:[%s1325_s9] ss:$0 sm:$0xff] }
 0x3aa   : > { %759 = vmatpush.msrb.mxu2 %v739_v31  ;;  %v666_v32 = vpop.permute.xlu2 %665  ;;  %v737_v35 = vmul.f32 %v1036_v34, %v1028_v19 }
 0x3ab   : > { %686 = vmatpush.msrb.mxu3 %v666_v32 }
 0x3ac   : > { %978 = vmatmul.msk.f32.vlgmr.msrb.gmra.mxu3 %vm486_vm5, %v664_v33  ;;  %v1016_v33 = vld [vmem:[%s1327_s11] ss:$0 sm:$0xff] }
 0x3ad   : > { %858 = vmatpush.msra.mxu3 %v838_v58 }
 0x3b1   : > { %981 = vmatmul.msk.f32.vlgmr.msrb.gmra.mxu2 %vm486_vm5, %v737_v35 }
 0x419   : > { %v547_v36 = vpop.f32.mrf.mxu2 }
 0x41a   : > { %550 = vst.msk [vmem:[#allocation2] sm:$0xff] %vm486_vm5, %v547_v36 }
 0x42c   : > { %v615_v37 = vpop.f32.mrf.mxu2 }
 0x42d   : > { %619 = vrot.lane.b32.xlu0 %v615_v37, %s1060_s17 }
 0x42f   : > { %v688_v38 = vpop.f32.mrf.mxu3 }
 0x430   : > { %692 = vrot.lane.b32.xlu1 %v688_v38, %s1061_s18 }
 0x434   : > { %v761_v39 = vpop.f32.mrf.mxu2 }
 0x435   : > { %765 = vrot.lane.b32.xlu2 %v761_v39, %s1062_s19 }
 0x48f   : > { %v766_v46 = vpop.permute.xlu2 %765 }
 0x49f   : > { %v620_v44 = vpop.permute.xlu0 %619 }
 0x4a0   : > { %623 = vst.msk [vmem:[#allocation2] sm:$0xff] %vm622_vm7, %v620_v44 }
 0x4a2   : > { %v693_v45 = vpop.permute.xlu1 %692 }
 0x4a3   : > { %696 = vst.msk [vmem:[#allocation2] sm:$0xff] %vm695_vm8, %v693_v45 }
 0x4a4   : > { %769 = vst.msk [vmem:[#allocation2] sm:$0xff] %vm768_vm9, %v766_v46 }
 0x4ab   : > { %v770_v47 = vld [vmem:[#allocation2] sm:$0xff] }
 0x4ac   : > { %982 = vmatmul.msk.f32.vlgmr.msrb.gmra.mxu1 %vm412_vm0, %v770_v47 }
 0x529   : > { %v799_v49 = vpop.f32.mrf.mxu1 }
 0x52a   : > { %v800_v50 = vadd.f32 %v1012_v48, %v799_v49 }
 0x52c   : > { %v1225_v51 = vadd.f32 %v800_v50, %v1144_v0  ;;  %v837_v0 = vld [vmem:[%s1324_s8 + $0x10] sm:$0xff] }
 0x52d   : > { %859 = vmatpush.msra.mxu3 %v837_v0 }
 0x52e   : > { %v805_v52 = vsel %vm412_vm0, %v1225_v51, 0.0 }
 0x52f   : > { %806 = vadd.xlane.f32.xlu0 %v805_v52  ;;  %860 = vmatpush.msra.mxu3 %v836_v59 }
 0x531   : > { %861 = vmatpush.msra.mxu3 %v835_v60 }
 0x5a2   : > { %v807_v53 = vpop.xlane.xlu0 %806 }
 0x5a3   : > { %v808_v54 = vmul.f32 %v807_v53, %v1148_v8 }
 0x5a5   : > { %v809_v55 = vsub.f32 %v1225_v51, %v808_v54 }
 0x5a7   : > { %v810_v56 = vmul.f32 %v809_v55, %v809_v55 }
 0x5a9   : > { %v811_v57 = vsel %vm412_vm0, %v810_v56, 0.0 }
 0x5aa   : > { %812 = vadd.xlane.f32.xlu1 %v811_v57 }
 0x61d   : > { %v813_v1 = vpop.xlane.xlu1 %812 }
 0x61e   : > { %v814_v2 = vmul.f32 %v813_v1, %v1148_v8  ;;  %v876_v8 = vld [vmem:[%s1326_s10 + $0x48] sm:$0xff] }
 0x61f   : > { %893 = vmatpush.msra.mxu0 %v876_v8 }
 0x620   : > { %v815_v4 = vadd.f32 1e-05, %v814_v2 }
 0x621   : > { %894 = vmatpush.msra.mxu0 %v875_v7 }
 0x622   : > { %1037 = vrsqrt.f32 %v815_v4  ;;  %vm822_vm11 = vweird.f32 %v815_v4 }
 0x623   : > { %895 = vmatpush.msra.mxu0 %v874_v10 }
 0x625   : > { %896 = vmatpush.msra.mxu0 %v873_v12 }
 0x627   : > { %897 = vmatpush.msra.mxu0 %v872_v14 }
 0x628   : > { %v1038_v9 = vpop.eup %1037 }
 0x629   : > { %v817_v11 = vmul.f32 %v1038_v9, %v815_v4  ;;  %vm823_vm10 = vweird.f32 %v1038_v9  ;;  %898 = vmatpush.msra.mxu0 %v871_v16 }
 0x62a   : > { %vm824_vm12 = vmor %vm822_vm11, %vm823_vm10 }
 0x62b   : > { %v818_v13 = vmul.f32 %v1038_v9, %v817_v11  ;;  %899 = vmatpush.msra.mxu0 %v870_v18 }
 0x62d   : > { %v819_v15 = vmul.f32 0.5, %v818_v13  ;;  %900 = vmatpush.msra.mxu0 %v869_v26 }
 0x62f   : > { %v820_v17 = vsub.f32 1.5, %v819_v15  ;;  %901 = vmatpush.msra.mxu0 %v868_v27 }
 0x631   : > { %v821_v19 = vmul.f32 %v1038_v9, %v820_v17  ;;  %902 = vmatpush.msra.mxu0 %v867_v28 }
 0x633   : > { %v825_v21 = vsel %vm824_vm12, %v1038_v9, %v821_v19 }
 0x634   : > { %v826_v22 = vmul.f32 %v825_v21, %v809_v55 }
 0x636   : > { %v830_v24 = vmul.f32 %v1013_v20, %v826_v22 }
 0x638   : > { %v834_v25 = vadd.f32 %v1014_v23, %v830_v24 }
 0x63a   : > { %983 = vmatmul.msk.f32.vlgmr.msra.gmra.mxu3 %vm412_vm0, %v834_v25 }
 0x6bd   : > { %v863_v30 = vpop.f32.mrf.mxu3 }
 0x6be   : > { %v864_v31 = vadd.f32 %v1015_v29, %v863_v30 }
 0x6c0   : > { %v866_v32 = vmax.f32 %v864_v31, 0.0 }
 0x6c2   : > { %903 = vmatmul.f32.vlgmr.msra.gmra.mxu0 %v866_v32 }
 0x73f   : > { %v904_v34 = vpop.f32.mrf.mxu0 }
 0x740   : > { %v905_v35 = vadd.f32 %v1016_v33, %v904_v34 }
 0x742   : > { %v907_v36 = vadd.f32 %v905_v35, %v1225_v51 }
 0x744   : > { %908 = vst.msk [vmem:[%s408_s20] sm:$0xff] %vm412_vm0, %v907_v36 }
 0x745 PF: > { %s22_s21 = sadd.s32 1, %s1045_s21  }
 0x746   : > { %p19_p4 = scmp.ge.s32.totalorder %s22_s21, 4  }
 0x748   :  { %21 = sbr.rel (!%p19_p4) target bundleno = 1 (0x1), region = 98 }

</bundles_post_ra>
